<compile_context>
chip_gen: v6e
topology: v6e:2x2x1
jax: 0.10.0
libtpu: 0.0.40
codegen_flags: <defaults>
</compile_context>

<pallas_src>
import functools

import jax
import jax.numpy as jnp
from jax.experimental import pallas as pl
from jax.experimental.pallas import tpu as pltpu


def _round_up(x, m):
    return (x + m - 1) // m * m


def _pick_tiling(n):
    """Choose (N_pad, tile): biggest tile that still yields >=2 row tiles.

    Big tiles amortize the ~0.35us/step pipeline overhead on the mem-bound adj
    stream (measured ~29% of roofline at 128 vs ~85% at 512); requiring >=2
    row tiles keeps both v7x TensorCores busy via the "parallel" axis.
    """
    for t in (512, 256, 128):
        n_pad = _round_up(n, t)
        if n_pad // t >= 2:
            return n_pad, t
    return _round_up(n, 128), 128


# ---------------------------------------------------------------------------
# Kernels
# ---------------------------------------------------------------------------
def fused_propagate_mlp_kernel(adj_ref, xall_ref, xi_ref, *rest, num_layers, tile):
    """Fused: h = x + (adj @ x) / deg, then h = MLP(h), for one row tile.

    adj_ref : (tile, tile) int8 streamed tile of the adjacency
    xall_ref: (N_pad, C_pad) bf16, VMEM-resident x (last column is all ones ->
              the MXU accumulates the row degree into acc[:, -1])
    xi_ref  : (tile, C_pad) f32 residual rows (fetched once per row tile)
    rest    = (w0, b0, ..., w_{L-1}, b_{L-1}, o_ref, acc_ref)
    Grid axis 1 is the adj reduction (marked "arbitrary", runs last).
    """
    wb_refs = rest[: 2 * num_layers]
    o_ref = rest[2 * num_layers]
    acc_ref = rest[2 * num_layers + 1]

    k = pl.program_id(1)

    @pl.when(k == 0)
    def _init():
        acc_ref[...] = jnp.zeros_like(acc_ref)

    # int8 -> bf16 widen is exact for 0/1 and is VPU filler under the DMA
    # stalls of the dominant adj stream.
    adj = adj_ref[...].astype(jnp.bfloat16)                   # (tile, tile)
    start = pl.multiple_of(k * tile, tile)
    xk = xall_ref[pl.ds(start, tile), :]                      # (tile, C_pad) bf16, resident
    acc_ref[...] += jnp.dot(adj, xk, preferred_element_type=jnp.float32)

    @pl.when(k == pl.num_programs(1) - 1)
    def _finalize():
        acc = acc_ref[...]                                    # (tile, C_pad) f32
        # ones-column trick: last column of acc is exactly the row degree
        deg = acc[:, -1:]                                     # (tile, 1)
        # Zero-degree guard (padded rows / isolated nodes); torch would produce
        # inf/nan here -- real callers add self-loops so deg >= 1.
        inv_deg = 1.0 / jnp.maximum(deg, 1e-12)               # exact divide (cheap, per-row)
        h = xi_ref[...] + acc * inv_deg                       # (tile, C_pad) f32
        # (column C_pad-1 of h becomes 1.0, but its first-layer weight row is
        #  zero by construction of the padding, so the MLP output is exact.)
        # MLP: Linear -> ReLU (-> dropout: identity in eval) ..., final Linear.
        # Weights/biases have constant index maps -> DMA'd once, VMEM-resident;
        # activations stay in vregs (no HBM round trips).
        # TODO(synk): dropout is eval-mode identity (no RNG mask).
        for layer in range(num_layers):
            w = wb_refs[2 * layer][...]
            b = wb_refs[2 * layer + 1][...]
            h = jnp.dot(h, w, preferred_element_type=jnp.float32) + b
            if layer < num_layers - 1:
                h = jnp.maximum(h, 0.0)
        o_ref[...] = h


def cos_sigmoid_kernel(a_ref, b_ref, o_ref):
    """a_ref/b_ref: (O_sub, E_tile) feature-major; o = sigmoid(cos(a, b)) per edge.

    cos = (a.b) / (max(||a||, eps) * max(||b||, eps)); eps applied as eps^2 on
    the squared norms so the rsqrt formulation preserves torch's semantics.
    Output is a lane-dense (1, E_tile) row (edges on the lane axis).
    """
    a = a_ref[...]
    b = b_ref[...]
    eps2 = jnp.float32(1e-16)                                 # (1e-8) ** 2
    dot = jnp.sum(a * b, axis=0, keepdims=True)               # (1, E_tile)
    na2 = jnp.sum(a * a, axis=0, keepdims=True)
    nb2 = jnp.sum(b * b, axis=0, keepdims=True)
    cos = dot * jax.lax.rsqrt(jnp.maximum(na2, eps2)) \
              * jax.lax.rsqrt(jnp.maximum(nb2, eps2))
    o_ref[...] = jax.nn.sigmoid(cos)


# ---------------------------------------------------------------------------
# pallas_call wrappers
# ---------------------------------------------------------------------------
def fused_propagate_mlp(adj_i8, x_red_bf16, x_res_f32, params_pad, *, out_pad, tile):
    N_pad, C_pad = x_res_f32.shape
    grid = (N_pad // tile, N_pad // tile)
    num_layers = len(params_pad)

    wb_args, wb_specs = [], []
    for (w, b) in params_pad:
        wb_args += [w, b]
        wb_specs += [pl.BlockSpec(w.shape, lambda i, k: (0, 0)),   # VMEM-resident
                     pl.BlockSpec(b.shape, lambda i, k: (0, 0))]

    kern = functools.partial(fused_propagate_mlp_kernel,
                             num_layers=num_layers, tile=tile)
    return pl.pallas_call(
        kern,
        out_shape=jax.ShapeDtypeStruct((N_pad, out_pad), jnp.float32),
        grid_spec=pltpu.PrefetchScalarGridSpec(
            num_scalar_prefetch=0,
            grid=grid,
            in_specs=[
                pl.BlockSpec((tile, tile), lambda i, k: (i, k)),     # adj int8 stream
                pl.BlockSpec((N_pad, C_pad), lambda i, k: (0, 0)),   # x bf16, VMEM resident
                pl.BlockSpec((tile, C_pad), lambda i, k: (i, 0)),    # residual rows (once/row tile)
                *wb_specs,
            ],
            out_specs=pl.BlockSpec((tile, out_pad), lambda i, k: (i, 0)),
            scratch_shapes=[
                pltpu.VMEM((tile, C_pad), jnp.float32),   # adj@x accumulator (degree in last col)
            ],
        ),
        compiler_params=pltpu.CompilerParams(
            dimension_semantics=("parallel", "arbitrary"),
            vmem_limit_bytes=48 * 1024 * 1024,
        ),
    )(adj_i8, x_red_bf16, x_res_f32, *wb_args)


def edge_head(a_t, b_t, e_tile):
    """a_t/b_t: (O_sub, E_pad) feature-major edge slabs; gridded over E."""
    O_sub, E_pad = a_t.shape
    grid = (E_pad // e_tile,)
    return pl.pallas_call(
        cos_sigmoid_kernel,
        out_shape=jax.ShapeDtypeStruct((1, E_pad), jnp.float32),
        grid=grid,
        in_specs=[pl.BlockSpec((O_sub, e_tile), lambda e: (0, e)),
                  pl.BlockSpec((O_sub, e_tile), lambda e: (0, e))],
        out_specs=pl.BlockSpec((1, e_tile), lambda e: (0, e)),
        compiler_params=pltpu.CompilerParams(
            dimension_semantics=("parallel",)),
    )(a_t, b_t)


# ---------------------------------------------------------------------------
# Parameters + full forward
# ---------------------------------------------------------------------------
def init_mlp_params(key, in_c, hidden_c, out_c, num_layers):
    """torch.nn.Linear-style init; W stored [in, out] (transposed vs torch)."""
    dims = [in_c] + [hidden_c] * (num_layers - 1) + [out_c]
    params = []
    for i in range(num_layers):
        fan_in, fan_out = dims[i], dims[i + 1]
        key, kw, kb = jax.random.split(key, 3)
        bound = 1.0 / (fan_in ** 0.5)
        w = jax.random.uniform(kw, (fan_in, fan_out), jnp.float32, -bound, bound)
        b = jax.random.uniform(kb, (1, fan_out), jnp.float32, -bound, bound)
        params.append((w, b))
    return params


def _pad_params(params, in_pad):
    """Zero-pad every Linear to 128-multiple feature dims (exact padding).

    The first layer's input dim is padded to `in_pad` (which includes the
    ones-column slot); its padded weight rows are zero, so the ones-column /
    zero-padded feature columns contribute nothing.
    """
    padded = []
    for idx, (w, b) in enumerate(params):
        fi, fo = w.shape
        fi_p = in_pad if idx == 0 else _round_up(fi, 128)
        fo_p = _round_up(fo, 128)
        w_p = jnp.zeros((fi_p, fo_p), jnp.float32).at[:fi, :fo].set(w)
        b_p = jnp.zeros((1, fo_p), jnp.float32).at[:, :fo].set(b)
        padded.append((w_p, b_p))
    return padded


def mlp_cos_forward(params, x, edges, adj):
    N, in_c = x.shape
    out_c = params[-1][0].shape[1]
    E = edges.shape[1]

    # ---- pick the tile FIRST, pad N to it (>=2 row tiles for v7x megacore) ----
    N_pad, tile = _pick_tiling(N)
    # +1 guarantees a free zero-padded column to hold the degree ones-column,
    # even when in_c is itself a multiple of 128.
    C_pad = _round_up(in_c + 1, 128)
    O_pad = _round_up(out_c, 128)
    assert in_c < C_pad  # required by the ones-column degree trick

    # residual operand: f32, streamed once per row tile
    x_res = jnp.zeros((N_pad, C_pad), jnp.float32).at[:N, :in_c].set(x)
    # reduction operand: bf16, VMEM-resident, last column = 1 -> MXU degree
    # (bf16 x introduces ~1e-3 relative error in the propagated term vs torch f32)
    x_red = jnp.zeros((N_pad, C_pad), jnp.bfloat16).at[:N, :in_c].set(
        x.astype(jnp.bfloat16))
    x_red = x_red.at[:, C_pad - 1].set(jnp.bfloat16(1.0))
    # adj: ONE narrow padded int8 copy (0/1 -> exact), no f32 intermediate.
    # TODO(synk): for repeated calls on a static graph, hoist this cast/pad out
    # of the per-call path (accept pre-padded int8 adj from the caller).
    adj_i8 = jnp.zeros((N_pad, N_pad), jnp.int8).at[:N, :N].set(adj.astype(jnp.int8))

    params_pad = _pad_params(params, C_pad)

    # ---- fused propagate + MLP: ONE pallas_call, h never round-trips HBM ----
    h_pad = fused_propagate_mlp(adj_i8, x_red, x_res, params_pad,
                                out_pad=O_pad, tile=tile)

    # ---- edge endpoints ----
    # The module must return h[edges] anyway, so the gather is done once here
    # in plain JAX and feeds both the returned tensor and the cos/sigmoid head.
    # TODO(synk): for very large E an in-kernel scalar-prefetch row gather
    # (pl.Element row indices) would avoid the padded copy + transpose.
    x_e_pad = h_pad[edges]                               # (2, E, O_pad)
    x_e = x_e_pad[:, :, :out_c]                          # matches torch's x[edges]

    # Edge head consumes only out_c rounded to 8 feature rows (not O_pad=128)
    # and is gridded over E so VMEM use does not scale with E.
    O_sub = _round_up(out_c, 8)
    e_tile = min(2048, _round_up(E, 128))
    E_pad = _round_up(E, e_tile)
    ab = jnp.zeros((2, E_pad, O_sub), jnp.float32).at[:, :E, :].set(
        x_e_pad[:, :, :O_sub])
    ab_t = jnp.transpose(ab, (0, 2, 1))                  # (2, O_sub, E_pad): edges on lane axis
    sim = edge_head(ab_t[0], ab_t[1], e_tile)[0, :E]     # (E,)
    return sim, x_e


# ---------------------------------------------------------------------------
# Pure-JAX f32 reference (for a sanity tolerance check)
# ---------------------------------------------------------------------------
def reference_forward(params, x, edges, adj):
    hp = jax.lax.Precision.HIGHEST
    deg = jnp.sum(adj, axis=-1, keepdims=True)
    h = x + jnp.dot(adj, x, precision=hp) / deg
    for (w, b) in params[:-1]:
        h = jnp.maximum(jnp.dot(h, w, precision=hp) + b, 0.0)
    w, b = params[-1]
    h = jnp.dot(h, w, precision=hp) + b
    x_e = h[edges]
    a, c = x_e[0], x_e[1]
    eps = 1e-8
    na = jnp.maximum(jnp.sqrt(jnp.sum(a * a, -1)), eps)
    nc = jnp.maximum(jnp.sqrt(jnp.sum(c * c, -1)), eps)
    sim = jax.nn.sigmoid(jnp.sum(a * c, -1) / (na * nc))
    return sim, x_e


if __name__ == "__main__":
    # Small but tiling-exercising sizes: N=300 -> N_pad=512 with tile=256
    # (2x2 grid: >=2 "parallel" row tiles + a real reduction axis).
    N, in_c, hidden_c, out_c, num_layers, E = 300, 8, 32, 16, 3, 64
    dropout = 0.5  # unused in eval mode

    key = jax.random.PRNGKey(0)
    key, kx, ka, ke, kp = jax.random.split(key, 5)

    x = jax.random.normal(kx, (N, in_c), jnp.float32)
    # random symmetric 0/1 adjacency with self-loops (avoids zero degrees)
    adj = (jax.random.uniform(ka, (N, N)) < 0.3).astype(jnp.float32)
    adj = jnp.maximum(adj, adj.T)
    adj = jnp.maximum(adj, jnp.eye(N, dtype=jnp.float32))
    edges = jax.random.randint(ke, (2, E), 0, N)

    params = init_mlp_params(kp, in_c, hidden_c, out_c, num_layers)

    fwd = jax.jit(mlp_cos_forward)
    sim, x_e = fwd(params, x, edges, adj)
    jax.block_until_ready((sim, x_e))

    assert sim.shape == (E,), sim.shape
    assert x_e.shape == (2, E, out_c), x_e.shape

    # sanity check vs pure-JAX f32 reference (bf16 adj@x operand -> loose tol)
    sim_ref, x_e_ref = reference_forward(params, x, edges, adj)
    assert bool(jnp.allclose(sim, sim_ref, atol=5e-2, rtol=5e-2)), \
        float(jnp.max(jnp.abs(sim - sim_ref)))
    assert bool(jnp.allclose(x_e, x_e_ref, atol=5e-2, rtol=5e-2)), \
        float(jnp.max(jnp.abs(x_e - x_e_ref)))

    print("KERNEL_OK")
</pallas_src>

<mosaic_0001>
module attributes {stable_mosaic.version = 11 : i64} {
  func.func @fused_propagate_mlp_kernel(%arg0: i32, %arg1: i32, %arg2: memref<256x256xi8, #tpu.memory_space<vmem>>, %arg3: memref<512x128xbf16, #tpu.memory_space<vmem>>, %arg4: memref<256x128xf32, #tpu.memory_space<vmem>>, %arg5: memref<128x128xf32, #tpu.memory_space<vmem>>, %arg6: memref<1x128xf32, #tpu.memory_space<vmem>>, %arg7: memref<128x128xf32, #tpu.memory_space<vmem>>, %arg8: memref<1x128xf32, #tpu.memory_space<vmem>>, %arg9: memref<128x128xf32, #tpu.memory_space<vmem>>, %arg10: memref<1x128xf32, #tpu.memory_space<vmem>>, %arg11: memref<256x128xf32, #tpu.memory_space<vmem>>, %arg12: memref<256x128xf32, #tpu.memory_space<vmem>>) attributes {dimension_semantics = [#tpu.dimension_semantics<parallel>, #tpu.dimension_semantics<arbitrary>], iteration_bounds = array<i64: 2, 2>, scalar_prefetch = 0 : i64, scratch_operands = 1 : i64, tpu.core_type = #tpu.core_type<tc>, window_params = [{transform_indices = @transform_0, window_bounds = array<i64: 256, 256>}, {pipeline_mode = #tpu.pipeline_mode<synchronous>, transform_indices = @transform_1, window_bounds = array<i64: 512, 128>}, {transform_indices = @transform_2, window_bounds = array<i64: 256, 128>}, {pipeline_mode = #tpu.pipeline_mode<synchronous>, transform_indices = @transform_3, window_bounds = array<i64: 128, 128>}, {pipeline_mode = #tpu.pipeline_mode<synchronous>, transform_indices = @transform_4, window_bounds = array<i64: 1, 128>}, {pipeline_mode = #tpu.pipeline_mode<synchronous>, transform_indices = @transform_5, window_bounds = array<i64: 128, 128>}, {pipeline_mode = #tpu.pipeline_mode<synchronous>, transform_indices = @transform_6, window_bounds = array<i64: 1, 128>}, {pipeline_mode = #tpu.pipeline_mode<synchronous>, transform_indices = @transform_7, window_bounds = array<i64: 128, 128>}, {pipeline_mode = #tpu.pipeline_mode<synchronous>, transform_indices = @transform_8, window_bounds = array<i64: 1, 128>}, {transform_indices = @transform_9, window_bounds = array<i64: 256, 128>}]} {
    %c0_i32 = arith.constant 0 : i32
    %0 = arith.cmpi eq, %arg1, %c0_i32 : i32
    %1 = arith.extui %0 : i1 to i32
    %c0_i32_0 = arith.constant 0 : i32
    %2 = arith.cmpi ne, %1, %c0_i32_0 : i32
    scf.if %2 {
      %cst_8 = arith.constant 0.000000e+00 : f32
      %16 = vector.broadcast %cst_8 : f32 to vector<256x128xf32>
      %c0_9 = arith.constant 0 : index
      %c0_10 = arith.constant 0 : index
      %17 = vector.load %arg12[%c0_9, %c0_10] : memref<256x128xf32, #tpu.memory_space<vmem>>, vector<256x128xf32>
      tpu.vector_store %arg12[%c0_9, %c0_10], %16 {strides = array<i32>} : memref<256x128xf32, #tpu.memory_space<vmem>>, vector<256x128xf32>,
    } else {
    }
    %c0 = arith.constant 0 : index
    %c0_1 = arith.constant 0 : index
    %3 = vector.load %arg2[%c0, %c0_1] : memref<256x256xi8, #tpu.memory_space<vmem>>, vector<256x256xi8>
    %4 = arith.sitofp %3 : vector<256x256xi8> to vector<256x256xbf16>
    %c256_i32 = arith.constant 256 : i32
    %5 = arith.muli %arg1, %c256_i32 : i32
    %6 = tpu.assume_multiple %5, 256 : i32
    %7 = arith.index_cast %6 : i32 to index
    %c0_2 = arith.constant 0 : index
    %8 = vector.load %arg3[%7, %c0_2] : memref<512x128xbf16, #tpu.memory_space<vmem>>, vector<256x128xbf16>
    %c0_3 = arith.constant 0 : index
    %c0_4 = arith.constant 0 : index
    %9 = vector.load %arg12[%c0_3, %c0_4] : memref<256x128xf32, #tpu.memory_space<vmem>>, vector<256x128xf32>
    %cst = arith.constant dense<0.000000e+00> : vector<256x128xf32>
    %10 = tpu.matmul %4, %8, %cst {dimension_numbers = #tpu.dot_dimension_numbers<[1], [0], [0], [1], [0, 0, 1, 1], [], []>} : vector<256x256xbf16>, vector<256x128xbf16>, vector<256x128xf32> -> vector<256x128xf32>
    %11 = arith.addf %9, %10 : vector<256x128xf32>
    %c0_5 = arith.constant 0 : index
    %c0_6 = arith.constant 0 : index
    %12 = vector.load %arg12[%c0_5, %c0_6] : memref<256x128xf32, #tpu.memory_space<vmem>>, vector<256x128xf32>
    tpu.vector_store %arg12[%c0_5, %c0_6], %11 {strides = array<i32>} : memref<256x128xf32, #tpu.memory_space<vmem>>, vector<256x128xf32>,
    %c1_i32 = arith.constant 1 : i32
    %13 = arith.cmpi eq, %arg1, %c1_i32 : i32
    %14 = arith.extui %13 : i1 to i32
    %c0_i32_7 = arith.constant 0 : i32
    %15 = arith.cmpi ne, %14, %c0_i32_7 : i32
    scf.if %15 {
      %c0_8 = arith.constant 0 : index
      %c0_9 = arith.constant 0 : index
      %16 = vector.load %arg12[%c0_8, %c0_9] : memref<256x128xf32, #tpu.memory_space<vmem>>, vector<256x128xf32>
      %17 = vector.extract_strided_slice %16 {offsets = [0, 127], sizes = [256, 1], strides = [1, 1]} : vector<256x128xf32> to vector<256x1xf32>
      %cst_10 = arith.constant 9.99999996E-13 : f32
      %18 = vector.broadcast %cst_10 : f32 to vector<256x1xf32>
      %19 = arith.maximumf %17, %18 : vector<256x1xf32>
      %cst_11 = arith.constant 1.000000e+00 : f32
      %20 = vector.broadcast %cst_11 : f32 to vector<256x1xf32>
      %21 = arith.divf %20, %19 : vector<256x1xf32>
      %c0_12 = arith.constant 0 : index
      %c0_13 = arith.constant 0 : index
      %22 = vector.load %arg4[%c0_12, %c0_13] : memref<256x128xf32, #tpu.memory_space<vmem>>, vector<256x128xf32>
      %23 = vector.broadcast %21 : vector<256x1xf32> to vector<256x128xf32>
      %24 = arith.mulf %16, %23 : vector<256x128xf32>
      %25 = arith.addf %22, %24 : vector<256x128xf32>
      %c0_14 = arith.constant 0 : index
      %c0_15 = arith.constant 0 : index
      %26 = vector.load %arg5[%c0_14, %c0_15] : memref<128x128xf32, #tpu.memory_space<vmem>>, vector<128x128xf32>
      %c0_16 = arith.constant 0 : index
      %c0_17 = arith.constant 0 : index
      %27 = vector.load %arg6[%c0_16, %c0_17] : memref<1x128xf32, #tpu.memory_space<vmem>>, vector<1x128xf32>
      %cst_18 = arith.constant dense<0.000000e+00> : vector<256x128xf32>
      %28 = tpu.matmul %25, %26, %cst_18 {dimension_numbers = #tpu.dot_dimension_numbers<[1], [0], [0], [1], [0, 0, 1, 1], [], []>} : vector<256x128xf32>, vector<128x128xf32>, vector<256x128xf32> -> vector<256x128xf32>
      %29 = vector.broadcast %27 : vector<1x128xf32> to vector<256x128xf32>
      %30 = arith.addf %28, %29 : vector<256x128xf32>
      %cst_19 = arith.constant 0.000000e+00 : f32
      %31 = vector.broadcast %cst_19 : f32 to vector<256x128xf32>
      %32 = arith.maximumf %30, %31 : vector<256x128xf32>
      %c0_20 = arith.constant 0 : index
      %c0_21 = arith.constant 0 : index
      %33 = vector.load %arg7[%c0_20, %c0_21] : memref<128x128xf32, #tpu.memory_space<vmem>>, vector<128x128xf32>
      %c0_22 = arith.constant 0 : index
      %c0_23 = arith.constant 0 : index
      %34 = vector.load %arg8[%c0_22, %c0_23] : memref<1x128xf32, #tpu.memory_space<vmem>>, vector<1x128xf32>
      %cst_24 = arith.constant dense<0.000000e+00> : vector<256x128xf32>
      %35 = tpu.matmul %32, %33, %cst_24 {dimension_numbers = #tpu.dot_dimension_numbers<[1], [0], [0], [1], [0, 0, 1, 1], [], []>} : vector<256x128xf32>, vector<128x128xf32>, vector<256x128xf32> -> vector<256x128xf32>
      %36 = vector.broadcast %34 : vector<1x128xf32> to vector<256x128xf32>
      %37 = arith.addf %35, %36 : vector<256x128xf32>
      %cst_25 = arith.constant 0.000000e+00 : f32
      %38 = vector.broadcast %cst_25 : f32 to vector<256x128xf32>
      %39 = arith.maximumf %37, %38 : vector<256x128xf32>
      %c0_26 = arith.constant 0 : index
      %c0_27 = arith.constant 0 : index
      %40 = vector.load %arg9[%c0_26, %c0_27] : memref<128x128xf32, #tpu.memory_space<vmem>>, vector<128x128xf32>
      %c0_28 = arith.constant 0 : index
      %c0_29 = arith.constant 0 : index
      %41 = vector.load %arg10[%c0_28, %c0_29] : memref<1x128xf32, #tpu.memory_space<vmem>>, vector<1x128xf32>
      %cst_30 = arith.constant dense<0.000000e+00> : vector<256x128xf32>
      %42 = tpu.matmul %39, %40, %cst_30 {dimension_numbers = #tpu.dot_dimension_numbers<[1], [0], [0], [1], [0, 0, 1, 1], [], []>} : vector<256x128xf32>, vector<128x128xf32>, vector<256x128xf32> -> vector<256x128xf32>
      %43 = vector.broadcast %41 : vector<1x128xf32> to vector<256x128xf32>
      %44 = arith.addf %42, %43 : vector<256x128xf32>
      %c0_31 = arith.constant 0 : index
      %c0_32 = arith.constant 0 : index
      %45 = vector.load %arg11[%c0_31, %c0_32] : memref<256x128xf32, #tpu.memory_space<vmem>>, vector<256x128xf32>
      tpu.vector_store %arg11[%c0_31, %c0_32], %44 {strides = array<i32>} : memref<256x128xf32, #tpu.memory_space<vmem>>, vector<256x128xf32>,
    } else {
    }
    return
  }
  func.func @transform_0(%arg0: i32, %arg1: i32) -> (i32, i32) {
    %c0_i32 = arith.constant 0 : i32
    return %arg0, %arg1 : i32, i32
  }
  func.func @transform_1(%arg0: i32, %arg1: i32) -> (i32, i32) {
    %c0_i32 = arith.constant 0 : i32
    %c0_i32_0 = arith.constant 0 : i32
    %c0_i32_1 = arith.constant 0 : i32
    return %c0_i32, %c0_i32_0 : i32, i32
  }
  func.func @transform_2(%arg0: i32, %arg1: i32) -> (i32, i32) {
    %c0_i32 = arith.constant 0 : i32
    %c0_i32_0 = arith.constant 0 : i32
    return %arg0, %c0_i32 : i32, i32
  }
  func.func @transform_3(%arg0: i32, %arg1: i32) -> (i32, i32) {
    %c0_i32 = arith.constant 0 : i32
    %c0_i32_0 = arith.constant 0 : i32
    %c0_i32_1 = arith.constant 0 : i32
    return %c0_i32, %c0_i32_0 : i32, i32
  }
  func.func @transform_4(%arg0: i32, %arg1: i32) -> (i32, i32) {
    %c0_i32 = arith.constant 0 : i32
    %c0_i32_0 = arith.constant 0 : i32
    %c0_i32_1 = arith.constant 0 : i32
    return %c0_i32, %c0_i32_0 : i32, i32
  }
  func.func @transform_5(%arg0: i32, %arg1: i32) -> (i32, i32) {
    %c0_i32 = arith.constant 0 : i32
    %c0_i32_0 = arith.constant 0 : i32
    %c0_i32_1 = arith.constant 0 : i32
    return %c0_i32, %c0_i32_0 : i32, i32
  }
  func.func @transform_6(%arg0: i32, %arg1: i32) -> (i32, i32) {
    %c0_i32 = arith.constant 0 : i32
    %c0_i32_0 = arith.constant 0 : i32
    %c0_i32_1 = arith.constant 0 : i32
    return %c0_i32, %c0_i32_0 : i32, i32
  }
  func.func @transform_7(%arg0: i32, %arg1: i32) -> (i32, i32) {
    %c0_i32 = arith.constant 0 : i32
    %c0_i32_0 = arith.constant 0 : i32
    %c0_i32_1 = arith.constant 0 : i32
    return %c0_i32, %c0_i32_0 : i32, i32
  }
  func.func @transform_8(%arg0: i32, %arg1: i32) -> (i32, i32) {
    %c0_i32 = arith.constant 0 : i32
    %c0_i32_0 = arith.constant 0 : i32
    %c0_i32_1 = arith.constant 0 : i32
    return %c0_i32, %c0_i32_0 : i32, i32
  }
  func.func @transform_9(%arg0: i32, %arg1: i32) -> (i32, i32) {
    %c0_i32 = arith.constant 0 : i32
    %c0_i32_0 = arith.constant 0 : i32
    return %arg0, %c0_i32 : i32, i32
  }
}

module attributes {stable_mosaic.version = 11 : i64} {
  func.func @cos_sigmoid_kernel(%arg0: i32, %arg1: memref<16x128xf32, #tpu.memory_space<vmem>>, %arg2: memref<16x128xf32, #tpu.memory_space<vmem>>, %arg3: memref<1x128xf32, #tpu.memory_space<vmem>>) attributes {dimension_semantics = [#tpu.dimension_semantics<parallel>], iteration_bounds = array<i64: 1>, scalar_prefetch = 0 : i64, scratch_operands = 0 : i64, tpu.core_type = #tpu.core_type<tc>, window_params = [{transform_indices = @transform_0, window_bounds = array<i64: 16, 128>}, {transform_indices = @transform_1, window_bounds = array<i64: 16, 128>}, {transform_indices = @transform_2, window_bounds = array<i64: 1, 128>}]} {
    %c0 = arith.constant 0 : index
    %c0_0 = arith.constant 0 : index
    %0 = vector.load %arg1[%c0, %c0_0] : memref<16x128xf32, #tpu.memory_space<vmem>>, vector<16x128xf32>
    %c0_1 = arith.constant 0 : index
    %c0_2 = arith.constant 0 : index
    %1 = vector.load %arg2[%c0_1, %c0_2] : memref<16x128xf32, #tpu.memory_space<vmem>>, vector<16x128xf32>
    %2 = arith.mulf %0, %1 : vector<16x128xf32>
    %cst = arith.constant dense<0.000000e+00> : vector<128xf32>
    %3 = vector.multi_reduction <add>, %2, %cst [0] : vector<16x128xf32> to vector<128xf32>
    %4 = vector.shape_cast %3 : vector<128xf32> to vector<1x128xf32>
    %5 = arith.mulf %0, %0 : vector<16x128xf32>
    %cst_3 = arith.constant dense<0.000000e+00> : vector<128xf32>
    %6 = vector.multi_reduction <add>, %5, %cst_3 [0] : vector<16x128xf32> to vector<128xf32>
    %7 = vector.shape_cast %6 : vector<128xf32> to vector<1x128xf32>
    %8 = arith.mulf %1, %1 : vector<16x128xf32>
    %cst_4 = arith.constant dense<0.000000e+00> : vector<128xf32>
    %9 = vector.multi_reduction <add>, %8, %cst_4 [0] : vector<16x128xf32> to vector<128xf32>
    %10 = vector.shape_cast %9 : vector<128xf32> to vector<1x128xf32>
    %cst_5 = arith.constant 1.000000e-16 : f32
    %11 = vector.broadcast %cst_5 : f32 to vector<1x128xf32>
    %12 = arith.maximumf %7, %11 : vector<1x128xf32>
    %13 = math.rsqrt %12 : vector<1x128xf32>
    %14 = arith.mulf %4, %13 : vector<1x128xf32>
    %cst_6 = arith.constant 1.000000e-16 : f32
    %15 = vector.broadcast %cst_6 : f32 to vector<1x128xf32>
    %16 = arith.maximumf %10, %15 : vector<1x128xf32>
    %17 = math.rsqrt %16 : vector<1x128xf32>
    %18 = arith.mulf %14, %17 : vector<1x128xf32>
    %19 = arith.negf %18 : vector<1x128xf32>
    %20 = math.exp %19 : vector<1x128xf32>
    %cst_7 = arith.constant 1.000000e+00 : f32
    %21 = vector.broadcast %cst_7 : f32 to vector<1x128xf32>
    %22 = arith.addf %21, %20 : vector<1x128xf32>
    %23 = arith.divf %21, %22 : vector<1x128xf32>
    %c0_8 = arith.constant 0 : index
    %c0_9 = arith.constant 0 : index
    %24 = vector.load %arg3[%c0_8, %c0_9] : memref<1x128xf32, #tpu.memory_space<vmem>>, vector<1x128xf32>
    tpu.vector_store %arg3[%c0_8, %c0_9], %23 {strides = array<i32>} : memref<1x128xf32, #tpu.memory_space<vmem>>, vector<1x128xf32>,
    return
  }
  func.func @transform_0(%arg0: i32) -> (i32, i32) {
    %c0_i32 = arith.constant 0 : i32
    %c0_i32_0 = arith.constant 0 : i32
    return %c0_i32, %arg0 : i32, i32
  }
  func.func @transform_1(%arg0: i32) -> (i32, i32) {
    %c0_i32 = arith.constant 0 : i32
    %c0_i32_0 = arith.constant 0 : i32
    return %c0_i32, %arg0 : i32, i32
  }
  func.func @transform_2(%arg0: i32) -> (i32, i32) {
    %c0_i32 = arith.constant 0 : i32
    %c0_i32_0 = arith.constant 0 : i32
    return %c0_i32, %arg0 : i32, i32
  }
}

</mosaic_0001>

<bundles_post_ra>
// kernel: mlp_cos_forward.3
= control target key start
LH: loop header
LB: loop body
LE: loop exit
PB: predicated region body
PF: predicated region fallthrough
CT: control target
= control target key end

     0   :  { %s98_s0 = inlined_call_operand.vmem [shape: f32[16,128], index: 0, kind: input, shape index: {}]   ;;  %s99_s1 = inlined_call_operand.vmem [shape: f32[16,128], index: 1, kind: input, shape index: {}]   ;;  %s100_s2 = inlined_call_operand.vmem [shape: f32[1,128], index: 2, kind: output, shape index: {}]  }
   0x1   :  { %v11_v0 = vld [vmem:[%s98_s0] sm:$0xff]  ;;  %v12_v1 = vld [vmem:[%s98_s0 + $0x8] sm:$0xff] }
   0x2   :  { %v13_v2 = vld [vmem:[%s99_s1] sm:$0xff]  ;;  %v14_v3 = vld [vmem:[%s99_s1 + $0x8] sm:$0xff]  ;;  %v24_v5 = vmul.f32 %v11_v0, %v11_v0  ;;  %v25_v6 = vmul.f32 %v12_v1, %v12_v1 }
   0x3   :  { %v15_v4 = vmul.f32 %v13_v2, %v11_v0  ;;  %v33_v7 = vmul.f32 %v13_v2, %v13_v2  ;;  %v16_v8 = vmul.f32 %v14_v3, %v12_v1  ;;  %v34_v9 = vmul.f32 %v14_v3, %v14_v3 }
   0x4   :  { %v26_v10 = vadd.f32 %v25_v6, %v24_v5 }
   0x5   :  { %v35_v11 = vadd.f32 %v34_v9, %v33_v7  ;;  %v17_v12 = vadd.f32 %v16_v8, %v15_v4 }
   0x6   :  { %v27_v13 = vrot.slane %v26_v10, 4 }
   0x7   :  { %v36_v14 = vrot.slane %v35_v11, 4  ;;  %v18_v17 = vrot.slane %v17_v12, 4 }
   0x8   :  { %v28_v15 = vadd.f32 %v27_v13, %v26_v10 }
   0x9   :  { %v37_v16 = vadd.f32 %v36_v14, %v35_v11  ;;  %v19_v22 = vadd.f32 %v18_v17, %v17_v12 }
   0xa   :  { %v29_v18 = vrot.slane %v28_v15, 2 }
   0xb   :  { %v38_v19 = vrot.slane %v37_v16, 2  ;;  %v20_v27 = vrot.slane %v19_v22, 2 }
   0xc   :  { %v30_v20 = vadd.f32 %v29_v18, %v28_v15 }
   0xd   :  { %v39_v21 = vadd.f32 %v38_v19, %v37_v16  ;;  %v21_v30 = vadd.f32 %v20_v27, %v19_v22 }
   0xe   :  { %v31_v23 = vrot.slane %v30_v20, 1 }
   0xf   :  { %v40_v24 = vrot.slane %v39_v21, 1  ;;  %v22_v31 = vrot.slane %v21_v30, 1 }
  0x10   :  { %v32_v25 = vadd.f32 %v31_v23, %v30_v20 }
  0x11   :  { %v41_v26 = vadd.f32 %v40_v24, %v39_v21  ;;  %v23_v32 = vadd.f32 %v22_v31, %v21_v30 }
  0x12   :  { %v42_v28 = vmax.f32 %v32_v25, 1e-16 }
  0x13   :  { %v45_v29 = vmax.f32 %v41_v26, 1e-16 }
  0x14   :  { %60 = vrsqrt.f32 %v42_v28 }
  0x15   :  { %62 = vrsqrt.f32 %v45_v29 }
  0x21   :  { %v61_v33 = vpop.eup %60 }
  0x22   :  { %v63_v34 = vpop.eup %62  ;;  %v44_v35 = vmul.f32 %v61_v33, %v23_v32 }
  0x24   :  { %v47_v36 = vmul.f32 %v63_v34, %v44_v35 }
  0x26   :  { %v59_v37 = vmul.f32 -1.442695, %v47_v36 }
  0x28   :  { %64 = vpow2.f32 %v59_v37 }
  0x35   :  { %v65_v38 = vpop.eup %64 }
  0x36   :  { %v51_v39 = vadd.f32 1.0, %v65_v38 }
  0x38   :  { %66 = vrcp.f32 %v51_v39 }
  0x45   :  { %v67_v40 = vpop.eup %66 }
  0x46   :  { %54 = vst [vmem:[%s100_s2] sm:$0x1] %v67_v40 }

// kernel: mlp_cos_forward.2
= control target key start
LH: loop header
LB: loop body
LE: loop exit
PB: predicated region body
PF: predicated region fallthrough
CT: control target
= control target key end

     0   :  { %s3052_s30 = smov 0   ;;  %s3054_s10 = smov 0   ;;  %s3726_s0 = inlined_call_operand.vmem [shape: s8[512,512], index: 0, kind: input, shape index: {}]   ;;  %s3727_s1 = inlined_call_operand.vmem [shape: bf16[512,128], index: 1, kind: input, shape index: {}]   ;;  %s3728_s2 = inlined_call_operand.vmem [shape: f32[512,128], index: 2, kind: input, shape index: {}]   ;;  %s3729_s3 = inlined_call_operand.vmem [shape: f32[128,128], index: 3, kind: input, shape index: {}]   ;;  %s3730_s4 = inlined_call_operand.vmem [shape: f32[1,128], index: 4, kind: input, shape index: {}]   ;;  %s3731_s5 = inlined_call_operand.vmem [shape: f32[128,128], index: 5, kind: input, shape index: {}]   ;;  %s3732_s6 = inlined_call_operand.vmem [shape: f32[1,128], index: 6, kind: input, shape index: {}]   ;;  %s3733_s7 = inlined_call_operand.vmem [shape: f32[128,128], index: 7, kind: input, shape index: {}]   ;;  %s3734_s8 = inlined_call_operand.vmem [shape: f32[1,128], index: 8, kind: input, shape index: {}]   ;;  %s3735_s9 = inlined_call_operand.vmem [shape: f32[512,128], index: 9, kind: output, shape index: {}]  }
   0x1   :  { %s3056_s11 = smov 0   ;;  %s3058_s12 = smov 0  }
   0x2   :  { %s3060_s13 = smov 0   ;;  %s3062_s14 = smov 0  }
   0x3   :  { %s3064_s15 = smov 0  }
   0x4 LB: > { %s28_s16 = sadd.s32 1, %s2990_s13  ;;  %s31_s17 = sadd.s32 1, %s2994_s14  ;;  %s2998_s15 = sphi %s3064_s15, %s19_s15   ;;  %s2994_s14 = sphi %s3062_s14, %s3744_s14   ;;  %s2990_s13 = sphi %s3060_s13, %s3743_s13   ;;  %s2986_s12 = sphi %s3058_s12, %s3742_s12   ;;  %s2982_s11 = sphi %s3056_s11, %s3741_s11   ;;  %s2978_s10 = sphi %s3054_s10, %s3740_s10   ;;  %s2974_s30 = sphi %s3052_s30, %s3739_s30  }
   0x5   : > { %p29_p0 = scmp.ge.s32.totalorder %s28_s16, 2  ;;  %p47_p1 = scmp.ne.s32.totalorder %s2978_s10, %s2974_s30 }
   0x6   : > { %p48_p2 = scmp.eq.s32.totalorder %s2998_s15, 0  ;;  %s40_s21 = sadd.s32 1, %s2978_s10 }
   0x7   : > { %s3746_s16 = smov (%p29_p0, %s28_s16), 0  ;;  %s3748_s17 = smov (!%p29_p0, %s31_s17), %s2994_s14 }
   0x8   : > { %p49_p3 = por %p48_p2, %p47_p1  ;;  %p33_p4 = scmp.ge.s32.totalorder %s3748_s17, 2 }
   0x9   : > { %s36_s18 = ssub.s32 %s2990_s13, %s3746_s16  ;;  %p2222_p6 = scmp.ge.s32.totalorder %s2998_s15, 4 }
   0xa   : > { %s3750_s17 = smov (%p33_p4, %s3748_s17), 0 }
   0xb   : > { %3737 = sst [smem:[#allocation4_spill]] %s3750_s17  ;;  %s35_s19 = ssub.s32 %s2994_s14, %s3750_s17 }
   0xc   : > { %s37_s20 = sor.u32 %s36_s18, %s35_s19  ;;  %293 = sbr.rel (%p2222_p6) target bundleno = 32 (0x20), region = 44 }
   0xd   : > { %p38_p5 = scmp.eq.s32.totalorder %s37_s20, 0 }
   0xf   : > { %s3103_s22 = scalar_select %p38_p5, %s2978_s10, %s40_s21  }
  0x11   : > { %296 = sbr.rel (!%p49_p3) target bundleno = 32 (0x20), region = 48  ;;  %s298_s23 = sand.u32 (%p49_p3), 1, %s2978_s10  }
  0x12   : > { %s2225_s24 = sshll.u32 (%p49_p3), %s2990_s13, 1  ;;  %s2223_s25 = sshll.u32 (%p49_p3), %s298_s23, 7 }
  0x13   : > { %s2259_s26 = sshll.u32 (%p49_p3), %s2994_s14, 5  ;;  %s300_s19 = scalar_lea.vmem (%p49_p3), [#allocation3], %s2223_s25 }
  0x14   : > { %s304_s27 = sadd.s32 (%p49_p3), %s2259_s26, %s2225_s24 }
  0x15   : > { %s2227_s28 = sshll.u32 (%p49_p3), %s304_s27, 3 }
  0x16   : > { %s3112_s18 = scalar_lea.vmem %s3726_s0, %s2227_s28 }
  0x17   : > { %v319_v0 = vld [vmem:[%s3112_s18] sm:$0xff]  ;;  %v321_v1 = vld [vmem:[%s3112_s18 + $0x8] sm:$0xff] }
  0x18   : > { %v323_v2 = vld [vmem:[%s3112_s18 + $0x20] sm:$0xff]  ;;  %320 = vst [vmem:[%s300_s19] sm:$0xff] %v319_v0  ;;  %322 = vst [vmem:[%s300_s19 + $0x8] sm:$0xff] %v321_v1  ;;  %v325_v3 = vld [vmem:[%s3112_s18 + $0x28] sm:$0xff] }
  0x19   : > { %324 = vst [vmem:[%s300_s19 + $0x10] sm:$0xff] %v323_v2  ;;  %v327_v4 = vld [vmem:[%s3112_s18 + $0x40] sm:$0xff]  ;;  %v329_v5 = vld [vmem:[%s3112_s18 + $0x48] sm:$0xff]  ;;  %326 = vst [vmem:[%s300_s19 + $0x18] sm:$0xff] %v325_v3 }
  0x1a   : > { %328 = vst [vmem:[%s300_s19 + $0x20] sm:$0xff] %v327_v4  ;;  %330 = vst [vmem:[%s300_s19 + $0x28] sm:$0xff] %v329_v5  ;;  %v331_v6 = vld [vmem:[%s3112_s18 + $0x60] sm:$0xff]  ;;  %v333_v7 = vld [vmem:[%s3112_s18 + $0x68] sm:$0xff] }
  0x1b   : > { %v335_v8 = vld [vmem:[%s3112_s18 + $0x80] sm:$0xff]  ;;  %332 = vst [vmem:[%s300_s19 + $0x30] sm:$0xff] %v331_v6  ;;  %334 = vst [vmem:[%s300_s19 + $0x38] sm:$0xff] %v333_v7  ;;  %v337_v9 = vld [vmem:[%s3112_s18 + $0x88] sm:$0xff] }
  0x1c   : > { %336 = vst [vmem:[%s300_s19 + $0x40] sm:$0xff] %v335_v8  ;;  %v339_v10 = vld [vmem:[%s3112_s18 + $0xa0] sm:$0xff]  ;;  %v341_v11 = vld [vmem:[%s3112_s18 + $0xa8] sm:$0xff]  ;;  %338 = vst [vmem:[%s300_s19 + $0x48] sm:$0xff] %v337_v9 }
  0x1d   : > { %340 = vst [vmem:[%s300_s19 + $0x50] sm:$0xff] %v339_v10  ;;  %342 = vst [vmem:[%s300_s19 + $0x58] sm:$0xff] %v341_v11  ;;  %v343_v12 = vld [vmem:[%s3112_s18 + $0xc0] sm:$0xff]  ;;  %v345_v13 = vld [vmem:[%s3112_s18 + $0xc8] sm:$0xff] }
  0x1e   : > { %v347_v14 = vld [vmem:[%s3112_s18 + $0xe0] sm:$0xff]  ;;  %344 = vst [vmem:[%s300_s19 + $0x60] sm:$0xff] %v343_v12  ;;  %346 = vst [vmem:[%s300_s19 + $0x68] sm:$0xff] %v345_v13  ;;  %v349_v15 = vld [vmem:[%s3112_s18 + $0xe8] sm:$0xff] }
  0x1f   : > { %348 = vst [vmem:[%s300_s19 + $0x70] sm:$0xff] %v347_v14  ;;  %350 = vst [vmem:[%s300_s19 + $0x78] sm:$0xff] %v349_v15 }
  0x20 PF: > { %p2228_p7 = scmp.ge.s32.totalorder %s2998_s15, 1  ;;  %p364_p8 = scmp.lt.s32.totalorder %s2998_s15, 5 }
  0x22   : > { %p365_p9 = pnand %p2228_p7, %p364_p8 }
  0x23   : > { %s371_s17 = sand.u32 (!%p365_p9), 1, %s2974_s30   ;;  %s2230_s20 = sshll.u32 (!%p365_p9), %s2986_s12, 5 }
  0x24   : > { %368 = sbr.rel (%p365_p9) target bundleno = 1168 (0x490), region = 75  ;;  %s2229_s21 = sshll.u32 (!%p365_p9), %s371_s17, 7 }
  0x25   : > { %p414_p10 = scmp.lt.s32.totalorder (!%p365_p9), %s2230_s20, 63  ;;  %s3144_s18 = scalar_lea.vmem (!%p365_p9), [#allocation3], %s2229_s21 }
  0x26   : > { %p2234_p11 = scmp.ne.s32.totalorder (!%p365_p9), %s2982_s11, 0 }
  0x29   : > { %s3752_s20 = smov (!%p414_p10, %s2230_s20), 63  ;;  %429 = sbr.rel (%p2234_p11) target bundleno = 63 (0x3f), region = 83 }
  0x2a   : > { %s2231_s23 = sshll.u32 %s3752_s20, 3 }
  0x2b   : > { %s3137_s26 = scalar_lea.vmem %s3728_s2, %s2231_s23  ;;  %s3142_s29 = scalar_lea.vmem %s3735_s9, %s2231_s23 }
  0x2e   : > { %v3000_v16 = vmov 0.0  }
  0x2f   : > { %430 = vst [vmem:[#allocation2 + $0xb0] sm:$0xff] %v3000_v16  ;;  %431 = vst [vmem:[#allocation2] sm:$0xff] %v3000_v16 }
  0x30   : > { %432 = vst [vmem:[#allocation2 + $0xd8] sm:$0xff] %v3000_v16  ;;  %433 = vst [vmem:[#allocation2 + $0x18] sm:$0xff] %v3000_v16 }
  0x31   : > { %434 = vst [vmem:[#allocation2 + $0x50] sm:$0xff] %v3000_v16  ;;  %435 = vst [vmem:[#allocation2 + $0x68] sm:$0xff] %v3000_v16 }
  0x32   : > { %436 = vst [vmem:[#allocation2 + $0x30] sm:$0xff] %v3000_v16  ;;  %437 = vst [vmem:[#allocation2 + $0x48] sm:$0xff] %v3000_v16 }
  0x33   : > { %438 = vst [vmem:[#allocation2 + $0x80] sm:$0xff] %v3000_v16  ;;  %439 = vst [vmem:[#allocation2 + $0x88] sm:$0xff] %v3000_v16 }
  0x34   : > { %440 = vst [vmem:[#allocation2 + $0xe8] sm:$0xff] %v3000_v16  ;;  %441 = vst [vmem:[#allocation2 + $0xb8] sm:$0xff] %v3000_v16 }
  0x35   : > { %442 = vst [vmem:[#allocation2 + $0x60] sm:$0xff] %v3000_v16  ;;  %443 = vst [vmem:[#allocation2 + $0xf0] sm:$0xff] %v3000_v16 }
  0x36   : > { %444 = vst [vmem:[#allocation2 + $0x8] sm:$0xff] %v3000_v16  ;;  %445 = vst [vmem:[#allocation2 + $0x78] sm:$0xff] %v3000_v16 }
  0x37   : > { %446 = vst [vmem:[#allocation2 + $0x38] sm:$0xff] %v3000_v16  ;;  %447 = vst [vmem:[#allocation2 + $0x58] sm:$0xff] %v3000_v16 }
  0x38   : > { %448 = vst [vmem:[#allocation2 + $0x40] sm:$0xff] %v3000_v16  ;;  %449 = vst [vmem:[#allocation2 + $0xc8] sm:$0xff] %v3000_v16 }
  0x39   : > { %450 = vst [vmem:[#allocation2 + $0xe0] sm:$0xff] %v3000_v16  ;;  %451 = vst [vmem:[#allocation2 + $0x90] sm:$0xff] %v3000_v16 }
  0x3a   : > { %452 = vst [vmem:[#allocation2 + $0x70] sm:$0xff] %v3000_v16  ;;  %453 = vst [vmem:[#allocation2 + $0xc0] sm:$0xff] %v3000_v16 }
  0x3b   : > { %454 = vst [vmem:[#allocation2 + $0xa8] sm:$0xff] %v3000_v16  ;;  %455 = vst [vmem:[#allocation2 + $0xd0] sm:$0xff] %v3000_v16 }
  0x3c   : > { %456 = vst [vmem:[#allocation2 + $0x10] sm:$0xff] %v3000_v16  ;;  %457 = vst [vmem:[#allocation2 + $0x28] sm:$0xff] %v3000_v16 }
  0x3d   : > { %458 = vst [vmem:[#allocation2 + $0xa0] sm:$0xff] %v3000_v16  ;;  %459 = vst [vmem:[#allocation2 + $0xf8] sm:$0xff] %v3000_v16 }
  0x3e   : > { %460 = vst [vmem:[#allocation2 + $0x20] sm:$0xff] %v3000_v16  ;;  %461 = vst [vmem:[#allocation2 + $0x98] sm:$0xff] %v3000_v16 }
  0x3f PF: > { %s2235_s30 = sshll.u32 %s2982_s11, 8  ;;  %v3149_v17 = vld [vmem:[%s3144_s18 + $0x8] sm:$0xff]  ;;  %v462_v37 = vld [vmem:[%s3144_s18] sm:$0xff]  ;;  %v465_v43 = vld [vmem:[%s3144_s18 + $0x18] sm:$0xff]  ;;  %p2253_p12 = scmp.ne.s32.totalorder %s2982_s11, 1 }
  0x40   : > { %v3152_v18 = vld [vmem:[%s3144_s18 + $0x48] sm:$0xff]  ;;  %s511_s12 = sshra.s32 %s2235_s30, 3  ;;  %v479_v19 = vunpack.c.l.s8.bf16 %v3149_v17  ;;  %v470_v38 = vld [vmem:[%s3144_s18 + $0x40] sm:$0xff]  ;;  %v478_v39 = vunpack.c.l.s8.bf16 %v462_v37  ;;  %v481_v41 = vunpack.c.h.s8.bf16 %v3149_v17  ;;  %v473_v44 = vld [vmem:[%s3144_s18 + $0x58] sm:$0xff]  ;;  %v480_v45 = vunpack.c.h.s8.bf16 %v462_v37 }
  0x41   : > { %v495_v20 = vunpack.c.l.s8.bf16 %v3152_v18  ;;  %s2236_s19 = sshll.u32 %s511_s12, 2  ;;  %v494_v40 = vunpack.c.l.s8.bf16 %v470_v38  ;;  %v497_v42 = vunpack.c.h.s8.bf16 %v3152_v18  ;;  %v496_v46 = vunpack.c.h.s8.bf16 %v470_v38  ;;  %v464_v49 = vld [vmem:[%s3144_s18 + $0x10] sm:$0xff]  ;;  %v467_v55 = vld [vmem:[%s3144_s18 + $0x28] sm:$0xff]  ;;  %v466_v61 = vld [vmem:[%s3144_s18 + $0x20] sm:$0xff] }
  0x42   : > { %s3159_s21 = scalar_lea.vmem %s3727_s1, %s2236_s19  ;;  %707 = vmatprep.mubr.bf16.mxu0 %v479_v19  ;;  %v483_v47 = vunpack.c.l.s8.bf16 %v465_v43  ;;  %v499_v48 = vunpack.c.l.s8.bf16 %v473_v44  ;;  %v472_v50 = vld [vmem:[%s3144_s18 + $0x50] sm:$0xff]  ;;  %v482_v51 = vunpack.c.l.s8.bf16 %v464_v49  ;;  %v485_v53 = vunpack.c.h.s8.bf16 %v465_v43  ;;  %v475_v56 = vld [vmem:[%s3144_s18 + $0x68] sm:$0xff]  ;;  %v474_v62 = vld [vmem:[%s3144_s18 + $0x60] sm:$0xff] }
  0x43   : > { %771 = vmatprep.mubr.bf16.mxu1 %v495_v20  ;;  %v2862_v21 = vld [vmem:[%s3159_s21 + $0x78] sm:$0xff]   ;;  %v2864_v23 = vld [vmem:[%s3159_s21 + $0x70] sm:$0xff]   ;;  %v2866_v25 = vld [vmem:[%s3159_s21 + $0x68] sm:$0xff]   ;;  %v498_v52 = vunpack.c.l.s8.bf16 %v472_v50  ;;  %v501_v54 = vunpack.c.h.s8.bf16 %v473_v44  ;;  %v484_v57 = vunpack.c.h.s8.bf16 %v464_v49  ;;  %v500_v58 = vunpack.c.h.s8.bf16 %v472_v50 }
  0x44   : > { %v2863_v22 = vld [vmem:[%s3159_s21 + $0x38] sm:$0xff]   ;;  %2260 = vmatprep.subr.bf16.mxu0 %v2862_v21  ;;  %2756 = vmatprep.subr.bf16.mxu1 %v2862_v21  ;;  %v2865_v24 = vld [vmem:[%s3159_s21 + $0x30] sm:$0xff]   ;;  %v2867_v26 = vld [vmem:[%s3159_s21 + $0x28] sm:$0xff]   ;;  %v487_v59 = vunpack.c.l.s8.bf16 %v467_v55  ;;  %v503_v60 = vunpack.c.l.s8.bf16 %v475_v56  ;;  %v486_v63 = vunpack.c.l.s8.bf16 %v466_v61  ;;  %v502_v0 = vunpack.c.l.s8.bf16 %v474_v62 }
  0x45   : > { %2261 = vmatpush3.bf16.msra.mxu0 %v2863_v22  ;;  %2764 = vmatpush3.bf16.msra.mxu1 %v2863_v22  ;;  %v2868_v27 = vld [vmem:[%s3159_s21 + $0x60] sm:$0xff]   ;;  %v2870_v29 = vld [vmem:[%s3159_s21 + $0x58] sm:$0xff]   ;;  %v2872_v31 = vld [vmem:[%s3159_s21 + $0x50] sm:$0xff]   ;;  %v489_v1 = vunpack.c.h.s8.bf16 %v467_v55  ;;  %v505_v2 = vunpack.c.h.s8.bf16 %v475_v56  ;;  %v488_v5 = vunpack.c.h.s8.bf16 %v466_v61  ;;  %v504_v6 = vunpack.c.h.s8.bf16 %v474_v62 }
  0x46   : > { %2262 = vmatprep.subr.bf16.mxu0 %v2864_v23  ;;  %2757 = vmatprep.subr.bf16.mxu1 %v2864_v23  ;;  %v2869_v28 = vld [vmem:[%s3159_s21 + $0x20] sm:$0xff]   ;;  %v2871_v30 = vld [vmem:[%s3159_s21 + $0x18] sm:$0xff]   ;;  %v2873_v32 = vld [vmem:[%s3159_s21 + $0x10] sm:$0xff]  }
  0x47   : > { %v2874_v33 = vld [vmem:[%s3159_s21 + $0x48] sm:$0xff]   ;;  %v2876_v35 = vld [vmem:[%s3159_s21 + $0x40] sm:$0xff]   ;;  %v469_v3 = vld [vmem:[%s3144_s18 + $0x38] sm:$0xff] }
  0x48   : > { %v2875_v34 = vld [vmem:[%s3159_s21 + $0x8] sm:$0xff]   ;;  %v2877_v36 = vld [vmem:[%s3159_s21] sm:$0xff]   ;;  %v477_v4 = vld [vmem:[%s3144_s18 + $0x78] sm:$0xff]  ;;  %v491_v7 = vunpack.c.l.s8.bf16 %v469_v3  ;;  %v493_v13 = vunpack.c.h.s8.bf16 %v469_v3 }
  0x49   : > { %2263 = vmatpush3.bf16.msra.mxu0 %v2865_v24  ;;  %2765 = vmatpush3.bf16.msra.mxu1 %v2865_v24  ;;  %v507_v8 = vunpack.c.l.s8.bf16 %v477_v4  ;;  %v468_v9 = vld [vmem:[%s3144_s18 + $0x30] sm:$0xff]  ;;  %v509_v14 = vunpack.c.h.s8.bf16 %v477_v4  ;;  %v563_v21 = vld [vmem:[#allocation2 + $0x38] sm:$0xff]  ;;  %v567_v61 = vld [vmem:[#allocation2 + $0xe0] sm:$0xff] }
  0x4a   : > { %2264 = vmatprep.subr.bf16.mxu0 %v2866_v25  ;;  %2758 = vmatprep.subr.bf16.mxu1 %v2866_v25  ;;  %v476_v10 = vld [vmem:[%s3144_s18 + $0x70] sm:$0xff]  ;;  %v490_v11 = vunpack.c.l.s8.bf16 %v468_v9  ;;  %v492_v15 = vunpack.c.h.s8.bf16 %v468_v9  ;;  %v550_v49 = vld [vmem:[#allocation2 + $0x18] sm:$0xff] }
  0x4b   : > { %v506_v12 = vunpack.c.l.s8.bf16 %v476_v10  ;;  %v508_v16 = vunpack.c.h.s8.bf16 %v476_v10  ;;  %v547_v19 = vld [vmem:[#allocation2 + $0xb0] sm:$0xff] }
  0x4d   : > { %2265 = vmatpush3.bf16.msra.mxu0 %v2867_v26  ;;  %2766 = vmatpush3.bf16.msra.mxu1 %v2867_v26 }
  0x4e   : > { %2266 = vmatprep.subr.bf16.mxu0 %v2868_v27  ;;  %2759 = vmatprep.subr.bf16.mxu1 %v2868_v27 }
  0x51   : > { %2267 = vmatpush3.bf16.msra.mxu0 %v2869_v28  ;;  %2767 = vmatpush3.bf16.msra.mxu1 %v2869_v28 }
  0x52   : > { %2268 = vmatprep.subr.bf16.mxu0 %v2870_v29  ;;  %2760 = vmatprep.subr.bf16.mxu1 %v2870_v29  ;;  %v548_v29 = vld [vmem:[#allocation2] sm:$0xff] }
  0x55   : > { %2269 = vmatpush3.bf16.msra.mxu0 %v2871_v30  ;;  %2768 = vmatpush3.bf16.msra.mxu1 %v2871_v30 }
  0x56   : > { %2270 = vmatprep.subr.bf16.mxu0 %v2872_v31  ;;  %2761 = vmatprep.subr.bf16.mxu1 %v2872_v31  ;;  %v564_v31 = vld [vmem:[#allocation2 + $0x58] sm:$0xff] }
  0x59   : > { %2271 = vmatpush3.bf16.msra.mxu0 %v2873_v32  ;;  %2769 = vmatpush3.bf16.msra.mxu1 %v2873_v32 }
  0x5a   : > { %2272 = vmatprep.subr.bf16.mxu0 %v2874_v33  ;;  %2762 = vmatprep.subr.bf16.mxu1 %v2874_v33 }
  0x5d   : > { %2273 = vmatpush3.bf16.msra.mxu0 %v2875_v34  ;;  %2770 = vmatpush3.bf16.msra.mxu1 %v2875_v34 }
  0x5e   : > { %2274 = vmatprep.subr.bf16.mxu0 %v2876_v35  ;;  %2763 = vmatprep.subr.bf16.mxu1 %v2876_v35 }
  0x61   : > { %2275 = vmatpush3.bf16.msra.mxu0 %v2877_v36  ;;  %2771 = vmatpush3.bf16.msra.mxu1 %v2877_v36 }
  0x64   : > { %708 = vmatmul.mubr.bf16.vlgmr.msra.gmra.mxu0 %v478_v39  ;;  %772 = vmatmul.mubr.bf16.vlgmr.msra.gmra.mxu1 %v494_v40  ;;  %v549_v39 = vld [vmem:[#allocation2 + $0xd8] sm:$0xff] }
  0x65   : > { %715 = vmatprep.mubr.bf16.mxu0 %v481_v41  ;;  %779 = vmatprep.mubr.bf16.mxu1 %v497_v42  ;;  %v565_v41 = vld [vmem:[#allocation2 + $0x40] sm:$0xff] }
  0x6c   : > { %716 = vmatmul.mubr.bf16.gmra.mxu0 %v480_v45  ;;  %780 = vmatmul.mubr.bf16.gmra.mxu1 %v496_v46 }
  0x6d   : > { %723 = vmatprep.mubr.bf16.mxu0 %v483_v47  ;;  %787 = vmatprep.mubr.bf16.mxu1 %v499_v48 }
  0x74   : > { %724 = vmatmul.mubr.bf16.gmra.mxu0 %v482_v51  ;;  %788 = vmatmul.mubr.bf16.gmra.mxu1 %v498_v52  ;;  %v566_v51 = vld [vmem:[#allocation2 + $0xc8] sm:$0xff] }
  0x75   : > { %731 = vmatprep.mubr.bf16.mxu0 %v485_v53  ;;  %795 = vmatprep.mubr.bf16.mxu1 %v501_v54 }
  0x7c   : > { %732 = vmatmul.mubr.bf16.gmra.mxu0 %v484_v57  ;;  %796 = vmatmul.mubr.bf16.gmra.mxu1 %v500_v58 }
  0x7d   : > { %739 = vmatprep.mubr.bf16.mxu0 %v487_v59  ;;  %803 = vmatprep.mubr.bf16.mxu1 %v503_v60  ;;  %v551_v59 = vld [vmem:[#allocation2 + $0x50] sm:$0xff] }
  0x84   : > { %740 = vmatmul.mubr.bf16.gmra.mxu0 %v486_v63  ;;  %804 = vmatmul.mubr.bf16.gmra.mxu1 %v502_v0 }
  0x85   : > { %747 = vmatprep.mubr.bf16.mxu0 %v489_v1  ;;  %811 = vmatprep.mubr.bf16.mxu1 %v505_v2 }
  0x8c   : > { %748 = vmatmul.mubr.bf16.gmra.mxu0 %v488_v5  ;;  %812 = vmatmul.mubr.bf16.gmra.mxu1 %v504_v6  ;;  %v552_v5 = vld [vmem:[#allocation2 + $0x68] sm:$0xff] }
  0x8d   : > { %755 = vmatprep.mubr.bf16.mxu0 %v491_v7  ;;  %819 = vmatprep.mubr.bf16.mxu1 %v507_v8  ;;  %v568_v7 = vld [vmem:[#allocation2 + $0x90] sm:$0xff] }
  0x94   : > { %756 = vmatmul.mubr.bf16.gmra.mxu0 %v490_v11  ;;  %820 = vmatmul.mubr.bf16.gmra.mxu1 %v506_v12 }
  0x95   : > { %763 = vmatprep.mubr.bf16.mxu0 %v493_v13  ;;  %827 = vmatprep.mubr.bf16.mxu1 %v509_v14 }
  0x9c   : > { %764 = vmatmul.mubr.bf16.gmra.mxu0 %v492_v15  ;;  %828 = vmatmul.mubr.bf16.gmra.mxu1 %v508_v16  ;;  %v553_v15 = vld [vmem:[#allocation2 + $0x30] sm:$0xff] }
 0x124   : > { %v2276_v17 = vpop.f32.mrf.mxu0  ;;  %v2324_v18 = vpop.f32.mrf.mxu1 }
 0x126   : > { %v2277_v20 = vpop.f32.mrf.mxu0  ;;  %v2325_v22 = vpop.f32.mrf.mxu1 }
 0x127   : > { %v2278_v23 = vadd.f32 %v2277_v20, %v2276_v17  ;;  %v2326_v24 = vadd.f32 %v2325_v22, %v2324_v18  ;;  %v569_v17 = vld [vmem:[#allocation2 + $0x70] sm:$0xff] }
 0x128   : > { %v2279_v25 = vpop.f32.mrf.mxu0  ;;  %v2327_v26 = vpop.f32.mrf.mxu1 }
 0x129   : > { %v836_v27 = vadd.f32 %v2278_v23, %v547_v19  ;;  %v852_v28 = vadd.f32 %v2326_v24, %v563_v21 }
 0x12a   : > { %v2280_v30 = vpop.f32.mrf.mxu0  ;;  %v2328_v32 = vpop.f32.mrf.mxu1 }
 0x12b   : > { %868 = vst [vmem:[#allocation2 + $0xb0] sm:$0xff] %v836_v27  ;;  %884 = vst [vmem:[#allocation2 + $0x38] sm:$0xff] %v852_v28  ;;  %v2281_v33 = vadd.f32 %v2280_v30, %v2279_v25  ;;  %v2329_v34 = vadd.f32 %v2328_v32, %v2327_v26  ;;  %v554_v25 = vld [vmem:[#allocation2 + $0x48] sm:$0xff]  ;;  %v570_v27 = vld [vmem:[#allocation2 + $0xc0] sm:$0xff] }
 0x12c   : > { %v2282_v35 = vpop.f32.mrf.mxu0  ;;  %v2330_v36 = vpop.f32.mrf.mxu1 }
 0x12d   : > { %v837_v37 = vadd.f32 %v2281_v33, %v548_v29  ;;  %v853_v38 = vadd.f32 %v2329_v34, %v564_v31 }
 0x12e   : > { %v2283_v40 = vpop.f32.mrf.mxu0  ;;  %v2331_v42 = vpop.f32.mrf.mxu1 }
 0x12f   : > { %869 = vst [vmem:[#allocation2] sm:$0xff] %v837_v37  ;;  %885 = vst [vmem:[#allocation2 + $0x58] sm:$0xff] %v853_v38  ;;  %v2284_v43 = vadd.f32 %v2283_v40, %v2282_v35  ;;  %v2332_v44 = vadd.f32 %v2331_v42, %v2330_v36  ;;  %v555_v35 = vld [vmem:[#allocation2 + $0x80] sm:$0xff]  ;;  %v571_v37 = vld [vmem:[#allocation2 + $0xa8] sm:$0xff] }
 0x130   : > { %v2285_v45 = vpop.f32.mrf.mxu0  ;;  %v2333_v46 = vpop.f32.mrf.mxu1 }
 0x131   : > { %v838_v47 = vadd.f32 %v2284_v43, %v549_v39  ;;  %v854_v48 = vadd.f32 %v2332_v44, %v565_v41 }
 0x132   : > { %v2286_v50 = vpop.f32.mrf.mxu0  ;;  %v2334_v52 = vpop.f32.mrf.mxu1 }
 0x133   : > { %870 = vst [vmem:[#allocation2 + $0xd8] sm:$0xff] %v838_v47  ;;  %886 = vst [vmem:[#allocation2 + $0x40] sm:$0xff] %v854_v48  ;;  %v2287_v53 = vadd.f32 %v2286_v50, %v2285_v45  ;;  %v2335_v54 = vadd.f32 %v2334_v52, %v2333_v46  ;;  %v556_v45 = vld [vmem:[#allocation2 + $0x88] sm:$0xff]  ;;  %v572_v47 = vld [vmem:[#allocation2 + $0xd0] sm:$0xff] }
 0x134   : > { %v2288_v55 = vpop.f32.mrf.mxu0  ;;  %v2336_v56 = vpop.f32.mrf.mxu1 }
 0x135   : > { %v839_v57 = vadd.f32 %v2287_v53, %v550_v49  ;;  %v855_v58 = vadd.f32 %v2335_v54, %v566_v51 }
 0x136   : > { %v2289_v60 = vpop.f32.mrf.mxu0  ;;  %v2337_v62 = vpop.f32.mrf.mxu1 }
 0x137   : > { %871 = vst [vmem:[#allocation2 + $0x18] sm:$0xff] %v839_v57  ;;  %887 = vst [vmem:[#allocation2 + $0xc8] sm:$0xff] %v855_v58  ;;  %v2290_v63 = vadd.f32 %v2289_v60, %v2288_v55  ;;  %v2338_v0 = vadd.f32 %v2337_v62, %v2336_v56  ;;  %v557_v55 = vld [vmem:[#allocation2 + $0xe8] sm:$0xff]  ;;  %v573_v57 = vld [vmem:[#allocation2 + $0x10] sm:$0xff] }
 0x138   : > { %v2291_v1 = vpop.f32.mrf.mxu0  ;;  %v2339_v2 = vpop.f32.mrf.mxu1 }
 0x139   : > { %v840_v3 = vadd.f32 %v2290_v63, %v551_v59  ;;  %v856_v4 = vadd.f32 %v2338_v0, %v567_v61 }
 0x13a   : > { %v2292_v6 = vpop.f32.mrf.mxu0  ;;  %v2340_v8 = vpop.f32.mrf.mxu1 }
 0x13b   : > { %872 = vst [vmem:[#allocation2 + $0x50] sm:$0xff] %v840_v3  ;;  %888 = vst [vmem:[#allocation2 + $0xe0] sm:$0xff] %v856_v4  ;;  %v2293_v9 = vadd.f32 %v2292_v6, %v2291_v1  ;;  %v2341_v10 = vadd.f32 %v2340_v8, %v2339_v2  ;;  %v558_v1 = vld [vmem:[#allocation2 + $0xb8] sm:$0xff]  ;;  %v574_v3 = vld [vmem:[#allocation2 + $0x28] sm:$0xff] }
 0x13c   : > { %v2294_v11 = vpop.f32.mrf.mxu0  ;;  %v2342_v12 = vpop.f32.mrf.mxu1 }
 0x13d   : > { %v841_v13 = vadd.f32 %v2293_v9, %v552_v5  ;;  %v857_v14 = vadd.f32 %v2341_v10, %v568_v7 }
 0x13e   : > { %v2295_v16 = vpop.f32.mrf.mxu0  ;;  %v2343_v18 = vpop.f32.mrf.mxu1 }
 0x13f   : > { %873 = vst [vmem:[#allocation2 + $0x68] sm:$0xff] %v841_v13  ;;  %889 = vst [vmem:[#allocation2 + $0x90] sm:$0xff] %v857_v14  ;;  %v2296_v19 = vadd.f32 %v2295_v16, %v2294_v11  ;;  %v2344_v20 = vadd.f32 %v2343_v18, %v2342_v12  ;;  %v559_v11 = vld [vmem:[#allocation2 + $0x60] sm:$0xff] }
 0x140   : > { %v2297_v21 = vpop.f32.mrf.mxu0  ;;  %v2345_v22 = vpop.f32.mrf.mxu1  ;;  %v575_v13 = vld [vmem:[#allocation2 + $0xa0] sm:$0xff] }
 0x141   : > { %v842_v23 = vadd.f32 %v2296_v19, %v553_v15  ;;  %v858_v24 = vadd.f32 %v2344_v20, %v569_v17 }
 0x142   : > { %v2298_v26 = vpop.f32.mrf.mxu0  ;;  %v2346_v28 = vpop.f32.mrf.mxu1 }
 0x143   : > { %874 = vst [vmem:[#allocation2 + $0x30] sm:$0xff] %v842_v23  ;;  %890 = vst [vmem:[#allocation2 + $0x70] sm:$0xff] %v858_v24  ;;  %v2299_v29 = vadd.f32 %v2298_v26, %v2297_v21  ;;  %v2347_v30 = vadd.f32 %v2346_v28, %v2345_v22  ;;  %v560_v21 = vld [vmem:[#allocation2 + $0xf0] sm:$0xff]  ;;  %v576_v23 = vld [vmem:[#allocation2 + $0xf8] sm:$0xff] }
 0x144   : > { %v2300_v31 = vpop.f32.mrf.mxu0  ;;  %v2348_v32 = vpop.f32.mrf.mxu1 }
 0x145   : > { %v843_v33 = vadd.f32 %v2299_v29, %v554_v25  ;;  %v859_v34 = vadd.f32 %v2347_v30, %v570_v27 }
 0x146   : > { %v2301_v36 = vpop.f32.mrf.mxu0  ;;  %v2349_v38 = vpop.f32.mrf.mxu1 }
 0x147   : > { %875 = vst [vmem:[#allocation2 + $0x48] sm:$0xff] %v843_v33  ;;  %891 = vst [vmem:[#allocation2 + $0xc0] sm:$0xff] %v859_v34  ;;  %v2302_v39 = vadd.f32 %v2301_v36, %v2300_v31  ;;  %v2350_v40 = vadd.f32 %v2349_v38, %v2348_v32  ;;  %v561_v31 = vld [vmem:[#allocation2 + $0x8] sm:$0xff]  ;;  %v577_v33 = vld [vmem:[#allocation2 + $0x20] sm:$0xff] }
 0x148   : > { %v2303_v41 = vpop.f32.mrf.mxu0  ;;  %v2351_v42 = vpop.f32.mrf.mxu1 }
 0x149   : > { %v844_v43 = vadd.f32 %v2302_v39, %v555_v35  ;;  %v860_v44 = vadd.f32 %v2350_v40, %v571_v37 }
 0x14a   : > { %v2304_v46 = vpop.f32.mrf.mxu0  ;;  %v2352_v48 = vpop.f32.mrf.mxu1 }
 0x14b   : > { %876 = vst [vmem:[#allocation2 + $0x80] sm:$0xff] %v844_v43  ;;  %892 = vst [vmem:[#allocation2 + $0xa8] sm:$0xff] %v860_v44  ;;  %v2305_v49 = vadd.f32 %v2304_v46, %v2303_v41  ;;  %v2353_v50 = vadd.f32 %v2352_v48, %v2351_v42  ;;  %v562_v41 = vld [vmem:[#allocation2 + $0x78] sm:$0xff] }
 0x14c   : > { %v2306_v51 = vpop.f32.mrf.mxu0  ;;  %v2354_v52 = vpop.f32.mrf.mxu1  ;;  %v578_v43 = vld [vmem:[#allocation2 + $0x98] sm:$0xff] }
 0x14d   : > { %v845_v53 = vadd.f32 %v2305_v49, %v556_v45  ;;  %v861_v54 = vadd.f32 %v2353_v50, %v572_v47 }
 0x14e   : > { %v2307_v56 = vpop.f32.mrf.mxu0  ;;  %v2355_v58 = vpop.f32.mrf.mxu1 }
 0x14f   : > { %877 = vst [vmem:[#allocation2 + $0x88] sm:$0xff] %v845_v53  ;;  %893 = vst [vmem:[#allocation2 + $0xd0] sm:$0xff] %v861_v54  ;;  %v2308_v59 = vadd.f32 %v2307_v56, %v2306_v51  ;;  %v2356_v60 = vadd.f32 %v2355_v58, %v2354_v52 }
 0x150   : > { %v2309_v61 = vpop.f32.mrf.mxu0  ;;  %v2357_v62 = vpop.f32.mrf.mxu1 }
 0x151   : > { %v846_v63 = vadd.f32 %v2308_v59, %v557_v55  ;;  %v862_v0 = vadd.f32 %v2356_v60, %v573_v57 }
 0x152   : > { %v2310_v2 = vpop.f32.mrf.mxu0  ;;  %v2358_v4 = vpop.f32.mrf.mxu1 }
 0x153   : > { %878 = vst [vmem:[#allocation2 + $0xe8] sm:$0xff] %v846_v63  ;;  %894 = vst [vmem:[#allocation2 + $0x10] sm:$0xff] %v862_v0  ;;  %v2311_v5 = vadd.f32 %v2310_v2, %v2309_v61  ;;  %v2359_v6 = vadd.f32 %v2358_v4, %v2357_v62 }
 0x154   : > { %v2312_v7 = vpop.f32.mrf.mxu0  ;;  %v2360_v8 = vpop.f32.mrf.mxu1 }
 0x155   : > { %v847_v9 = vadd.f32 %v2311_v5, %v558_v1  ;;  %v863_v10 = vadd.f32 %v2359_v6, %v574_v3 }
 0x156   : > { %v2313_v12 = vpop.f32.mrf.mxu0  ;;  %v2361_v14 = vpop.f32.mrf.mxu1 }
 0x157   : > { %879 = vst [vmem:[#allocation2 + $0xb8] sm:$0xff] %v847_v9  ;;  %895 = vst [vmem:[#allocation2 + $0x28] sm:$0xff] %v863_v10  ;;  %v2314_v15 = vadd.f32 %v2313_v12, %v2312_v7  ;;  %v2362_v16 = vadd.f32 %v2361_v14, %v2360_v8 }
 0x158   : > { %v2315_v17 = vpop.f32.mrf.mxu0  ;;  %v2363_v18 = vpop.f32.mrf.mxu1 }
 0x159   : > { %v848_v19 = vadd.f32 %v2314_v15, %v559_v11  ;;  %v864_v20 = vadd.f32 %v2362_v16, %v575_v13 }
 0x15a   : > { %v2316_v22 = vpop.f32.mrf.mxu0  ;;  %v2364_v24 = vpop.f32.mrf.mxu1 }
 0x15b   : > { %880 = vst [vmem:[#allocation2 + $0x60] sm:$0xff] %v848_v19  ;;  %896 = vst [vmem:[#allocation2 + $0xa0] sm:$0xff] %v864_v20  ;;  %v2317_v25 = vadd.f32 %v2316_v22, %v2315_v17  ;;  %v2365_v26 = vadd.f32 %v2364_v24, %v2363_v18 }
 0x15c   : > { %v2318_v27 = vpop.f32.mrf.mxu0  ;;  %v2366_v28 = vpop.f32.mrf.mxu1 }
 0x15d   : > { %v849_v29 = vadd.f32 %v2317_v25, %v560_v21  ;;  %v865_v30 = vadd.f32 %v2365_v26, %v576_v23 }
 0x15e   : > { %v2319_v32 = vpop.f32.mrf.mxu0  ;;  %v2367_v34 = vpop.f32.mrf.mxu1 }
 0x15f   : > { %881 = vst [vmem:[#allocation2 + $0xf0] sm:$0xff] %v849_v29  ;;  %897 = vst [vmem:[#allocation2 + $0xf8] sm:$0xff] %v865_v30  ;;  %v2320_v35 = vadd.f32 %v2319_v32, %v2318_v27  ;;  %v2368_v36 = vadd.f32 %v2367_v34, %v2366_v28 }
 0x160   : > { %v2321_v37 = vpop.f32.mrf.mxu0  ;;  %v2369_v38 = vpop.f32.mrf.mxu1 }
 0x161   : > { %v850_v39 = vadd.f32 %v2320_v35, %v561_v31  ;;  %v866_v40 = vadd.f32 %v2368_v36, %v577_v33 }
 0x162   : > { %v2322_v42 = vpop.f32.mrf.mxu0  ;;  %v2370_v44 = vpop.f32.mrf.mxu1 }
 0x163   : > { %882 = vst [vmem:[#allocation2 + $0x8] sm:$0xff] %v850_v39  ;;  %898 = vst [vmem:[#allocation2 + $0x20] sm:$0xff] %v866_v40  ;;  %v2323_v45 = vadd.f32 %v2322_v42, %v2321_v37  ;;  %v2371_v46 = vadd.f32 %v2370_v44, %v2369_v38  ;;  %903 = sbr.rel (%p2253_p12) target bundleno = 1168 (0x490), region = 87 }
 0x165   : > { %v851_v47 = vadd.f32 %v2323_v45, %v562_v41  ;;  %v867_v48 = vadd.f32 %v2371_v46, %v578_v43 }
 0x167   : > { %883 = vst [vmem:[#allocation2 + $0x78] sm:$0xff] %v851_v47  ;;  %899 = vst [vmem:[#allocation2 + $0x98] sm:$0xff] %v867_v48 }
 0x168   : > { %v3194_v49 = vld [vmem:[#allocation2 + $0xd8] sm:$0xff]  ;;  %v3196_v50 = vld [vmem:[#allocation2 + $0xb0] sm:$0xff]  ;;  %v3001_v52 = vmov 127   ;;  %v3203_v56 = vld [vmem:[#allocation2] sm:$0xff] }
 0x169   : > { %v3198_v51 = vld [vmem:[#allocation2 + $0x18] sm:$0xff]  ;;  %2879 = vset.pattern.permute.xlu1 %v3001_v52  ;;  %2878 = vset.pattern.permute.xlu0 %v3001_v52  ;;  %v938_v53 = vmax.f32 %v3194_v49, 1e-12  ;;  %v936_v54 = vmax.f32 %v3196_v50, 1e-12  ;;  %v3205_v57 = vld [vmem:[#allocation2 + $0x68] sm:$0xff] }
 0x16a   : > { %v939_v55 = vmax.f32 %v3198_v51, 1e-12  ;;  %v937_v58 = vmax.f32 %v3203_v56, 1e-12  ;;  %v3208_v59 = vld [vmem:[#allocation2 + $0x50] sm:$0xff]  ;;  %v3212_v62 = vld [vmem:[#allocation2 + $0x48] sm:$0xff] }
 0x16b   : > { %2880 = vrcp.f32 %v938_v53  ;;  %v941_v60 = vmax.f32 %v3205_v57, 1e-12  ;;  %v940_v61 = vmax.f32 %v3208_v59, 1e-12  ;;  %v3214_v63 = vld [vmem:[#allocation2 + $0x30] sm:$0xff]  ;;  %v3218_v2 = vld [vmem:[#allocation2 + $0x88] sm:$0xff] }
 0x16c   : > { %2882 = vrcp.f32 %v936_v54  ;;  %v943_v0 = vmax.f32 %v3212_v62, 1e-12  ;;  %v942_v1 = vmax.f32 %v3214_v63, 1e-12  ;;  %v3220_v3 = vld [vmem:[#allocation2 + $0x80] sm:$0xff]  ;;  %v3224_v6 = vld [vmem:[#allocation2 + $0xb8] sm:$0xff] }
 0x16d   : > { %2884 = vrcp.f32 %v939_v55  ;;  %v945_v4 = vmax.f32 %v3218_v2, 1e-12  ;;  %v944_v5 = vmax.f32 %v3220_v3, 1e-12  ;;  %v3226_v7 = vld [vmem:[#allocation2 + $0xe8] sm:$0xff]  ;;  %v3230_v13 = vld [vmem:[#allocation2 + $0xf0] sm:$0xff] }
 0x16e   : > { %2886 = vrcp.f32 %v937_v58  ;;  %v947_v10 = vmax.f32 %v3224_v6, 1e-12  ;;  %v946_v12 = vmax.f32 %v3226_v7, 1e-12  ;;  %v3232_v15 = vld [vmem:[#allocation2 + $0x60] sm:$0xff]  ;;  %v1303_v16 = vld [vmem:[%s3729_s3 + $0x78] sm:$0xff] }
 0x16f   : > { %2888 = vrcp.f32 %v941_v60  ;;  %v949_v17 = vmax.f32 %v3230_v13, 1e-12  ;;  %2516 = vmatprep.subr.mxu0 %v1303_v16  ;;  %v1302_v18 = vld [vmem:[%s3729_s3 + $0x70] sm:$0xff]  ;;  %v948_v20 = vmax.f32 %v3232_v15, 1e-12  ;;  %v3242_v21 = vld [vmem:[#allocation2 + $0x78] sm:$0xff]  ;;  %2772 = vmatprep.subr.mxu1 %v1303_v16 }
 0x170   : > { %2890 = vrcp.f32 %v940_v61  ;;  %2517 = vmatpush3.msra.mxu0 %v1303_v16  ;;  %v1301_v22 = vld [vmem:[%s3729_s3 + $0x68] sm:$0xff]  ;;  %v1300_v25 = vld [vmem:[%s3729_s3 + $0x60] sm:$0xff]  ;;  %2788 = vmatpush3.msra.mxu1 %v1303_v16  ;;  %v951_v26 = vmax.f32 %v3242_v21, 1e-12  ;;  %v3254_v29 = vld [vmem:[#allocation2 + $0x58] sm:$0xff] }
 0x171   : > { %2892 = vrcp.f32 %v943_v0  ;;  %v3247_v24 = vld [vmem:[#allocation2 + $0x8] sm:$0xff]  ;;  %2518 = vmatprep.subr.mxu0 %v1302_v18  ;;  %v1299_v30 = vld [vmem:[%s3729_s3 + $0x58] sm:$0xff]  ;;  %2773 = vmatprep.subr.mxu1 %v1302_v18  ;;  %v3264_v33 = vld [vmem:[%s3729_s3 + $0x50] sm:$0xff]  ;;  %v953_v34 = vmax.f32 %v3254_v29, 1e-12 }
 0x172   : > { %2894 = vrcp.f32 %v942_v1  ;;  %2519 = vmatpush3.msra.mxu0 %v1302_v18  ;;  %v950_v28 = vmax.f32 %v3247_v24, 1e-12  ;;  %v3259_v32 = vld [vmem:[#allocation2 + $0x38] sm:$0xff]  ;;  %2789 = vmatpush3.msra.mxu1 %v1302_v18  ;;  %v3268_v37 = vld [vmem:[#allocation2 + $0xc8] sm:$0xff]  ;;  %v3275_v40 = vld [vmem:[#allocation2 + $0x40] sm:$0xff] }
 0x173   : > { %2896 = vrcp.f32 %v945_v4  ;;  %2520 = vmatprep.subr.mxu0 %v1301_v22  ;;  %v952_v36 = vmax.f32 %v3259_v32, 1e-12  ;;  %v3273_v38 = vld [vmem:[%s3729_s3 + $0x48] sm:$0xff]  ;;  %2774 = vmatprep.subr.mxu1 %v1301_v22  ;;  %v3282_v41 = vld [vmem:[%s3729_s3 + $0x40] sm:$0xff]  ;;  %v955_v42 = vmax.f32 %v3268_v37, 1e-12 }
 0x174   : > { %2898 = vrcp.f32 %v944_v5  ;;  %2521 = vmatpush3.msra.mxu0 %v1301_v22  ;;  %2790 = vmatpush3.msra.mxu1 %v1301_v22  ;;  %v954_v44 = vmax.f32 %v3275_v40, 1e-12  ;;  %v3287_v45 = vld [vmem:[#allocation2 + $0x90] sm:$0xff]  ;;  %v3293_v46 = vld [vmem:[%s3729_s3 + $0x38] sm:$0xff]  ;;  %v3295_v48 = vld [vmem:[#allocation2 + $0xe0] sm:$0xff] }
 0x175   : > { %2900 = vrcp.f32 %v947_v10  ;;  %2522 = vmatprep.subr.mxu0 %v1300_v25  ;;  %2775 = vmatprep.subr.mxu1 %v1300_v25  ;;  %v3302_v52 = vld [vmem:[%s3729_s3 + $0x30] sm:$0xff]  ;;  %v957_v53 = vmax.f32 %v3287_v45, 1e-12  ;;  %v956_v55 = vmax.f32 %v3295_v48, 1e-12  ;;  %v3307_v58 = vld [vmem:[#allocation2 + $0xc0] sm:$0xff] }
 0x176   : > { %2902 = vrcp.f32 %v946_v12  ;;  %2523 = vmatpush3.msra.mxu0 %v1300_v25  ;;  %2791 = vmatpush3.msra.mxu1 %v1300_v25  ;;  %v3313_v60 = vld [vmem:[%s3729_s3 + $0x28] sm:$0xff]  ;;  %v3315_v0 = vld [vmem:[#allocation2 + $0x70] sm:$0xff]  ;;  %v3322_v1 = vld [vmem:[%s3729_s3 + $0x20] sm:$0xff]  ;;  %v959_v4 = vmax.f32 %v3307_v58, 1e-12 }
 0x177   : > { %2904 = vrcp.f32 %v949_v17  ;;  %2524 = vmatprep.subr.mxu0 %v1299_v30  ;;  %2776 = vmatprep.subr.mxu1 %v1299_v30  ;;  %v3333_v10 = vld [vmem:[%s3729_s3 + $0x18] sm:$0xff]  ;;  %v3335_v12 = vld [vmem:[#allocation2 + $0xa8] sm:$0xff]  ;;  %v1288_v25 = vld [vmem:[%s3729_s3] sm:$0xff] }
 0x178   : > { %v2881_v8 = vpop.eup %2880  ;;  %2906 = vrcp.f32 %v948_v20  ;;  %2525 = vmatpush3.msra.mxu0 %v1299_v30  ;;  %2792 = vmatpush3.msra.mxu1 %v1299_v30  ;;  %v960_v18 = vmax.f32 %v3335_v12, 1e-12  ;;  %v3355_v20 = vld [vmem:[%s3729_s3 + $0x8] sm:$0xff]  ;;  %v3369_v30 = vld [vmem:[#allocation2 + $0xf8] sm:$0xff] }
 0x179   : > { %v2883_v9 = vpop.eup %2882  ;;  %1076 = vperm.xlu1 %2879, %v2881_v8   ;;  %2908 = vrcp.f32 %v951_v26  ;;  %2526 = vmatprep.subr.mxu0 %v3264_v33  ;;  %v958_v8 = vmax.f32 %v3315_v0, 1e-12 }
 0x17a   : > { %v2885_v11 = vpop.eup %2884  ;;  %1066 = vperm.xlu0 %2878, %v2883_v9   ;;  %2910 = vrcp.f32 %v950_v28  ;;  %2527 = vmatpush3.msra.mxu0 %v3264_v33  ;;  %v3327_v9 = vld [vmem:[#allocation2 + $0xd0] sm:$0xff] }
 0x17b   : > { %v2887_v14 = vpop.eup %2886  ;;  %2912 = vrcp.f32 %v953_v34  ;;  %2528 = vmatprep.subr.mxu0 %v3273_v38  ;;  %2777 = vmatprep.subr.mxu1 %v3264_v33  ;;  %v961_v16 = vmax.f32 %v3327_v9, 1e-12  ;;  %v965_v34 = vmax.f32 %v3369_v30, 1e-12 }
 0x17c   : > { %v2889_v19 = vpop.eup %2888  ;;  %2914 = vrcp.f32 %v952_v36  ;;  %2529 = vmatpush3.msra.mxu0 %v3273_v38  ;;  %2793 = vmatpush3.msra.mxu1 %v3264_v33  ;;  %v3372_v33 = vld [vmem:[#allocation2 + $0xa0] sm:$0xff] }
 0x17d   : > { %1081 = vperm.xlu1 %2879, %v2885_v11   ;;  %v2891_v23 = vpop.eup %2890  ;;  %2530 = vmatprep.subr.mxu0 %v3282_v41  ;;  %2916 = vrcp.f32 %v955_v42  ;;  %v964_v36 = vmax.f32 %v3372_v33, 1e-12  ;;  %v3382_v42 = vld [vmem:[#allocation2 + $0x20] sm:$0xff] }
 0x17e   : > { %1071 = vperm.xlu0 %2878, %v2887_v14   ;;  %v2893_v27 = vpop.eup %2892  ;;  %2531 = vmatpush3.msra.mxu0 %v3282_v41  ;;  %2918 = vrcp.f32 %v954_v44  ;;  %v3343_v14 = vld [vmem:[%s3729_s3 + $0x10] sm:$0xff]  ;;  %v966_v44 = vmax.f32 %v3382_v42, 1e-12 }
 0x17f   : > { %v2895_v31 = vpop.eup %2894  ;;  %2532 = vmatprep.subr.mxu0 %v3293_v46  ;;  %2920 = vrcp.f32 %v957_v53  ;;  %2778 = vmatprep.subr.mxu1 %v3273_v38 }
 0x180   : > { %v2897_v35 = vpop.eup %2896  ;;  %2533 = vmatpush3.msra.mxu0 %v3293_v46  ;;  %2922 = vrcp.f32 %v956_v55  ;;  %2794 = vmatpush3.msra.mxu1 %v3273_v38  ;;  %v3379_v38 = vld [vmem:[#allocation2 + $0x98] sm:$0xff] }
 0x181   : > { %1091 = vperm.xlu1 %2879, %v2889_v19   ;;  %v2899_v39 = vpop.eup %2898  ;;  %2534 = vmatprep.subr.mxu0 %v3302_v52  ;;  %2924 = vrcp.f32 %v959_v4  ;;  %v3349_v19 = vld [vmem:[#allocation2 + $0x28] sm:$0xff]  ;;  %v3401_v4 = vld [vmem:[%s3731_s5 + $0x78] sm:$0xff] }
 0x182   : > { %1086 = vperm.xlu0 %2878, %v2891_v23   ;;  %v2901_v43 = vpop.eup %2900  ;;  %2535 = vmatpush3.msra.mxu0 %v3302_v52  ;;  %2926 = vrcp.f32 %v958_v8  ;;  %v3357_v23 = vld [vmem:[#allocation2 + $0x10] sm:$0xff]  ;;  %v963_v26 = vmax.f32 %v3349_v19, 1e-12 }
 0x183   : > { %v2903_v47 = vpop.eup %2902  ;;  %2536 = vmatprep.subr.mxu0 %v3313_v60  ;;  %2928 = vrcp.f32 %v961_v16  ;;  %v962_v28 = vmax.f32 %v3357_v23, 1e-12  ;;  %2779 = vmatprep.subr.mxu1 %v3282_v41  ;;  %v1034_v16 = vld [vmem:[%s3137_s26 + $0x10] sm:$0xff] }
 0x184   : > { %v2905_v54 = vpop.eup %2904  ;;  %2537 = vmatpush3.msra.mxu0 %v3313_v60  ;;  %2930 = vrcp.f32 %v960_v18  ;;  %2795 = vmatpush3.msra.mxu1 %v3282_v41  ;;  %v967_v41 = vmax.f32 %v3379_v38, 1e-12 }
 0x185   : > { %1101 = vperm.xlu1 %2879, %v2893_v27   ;;  %v2907_v61 = vpop.eup %2906  ;;  %2538 = vmatprep.subr.mxu0 %v3322_v1  ;;  %2932 = vrcp.f32 %v963_v26 }
 0x186   : > { %1096 = vperm.xlu0 %2878, %v2895_v31   ;;  %v2909_v5 = vpop.eup %2908  ;;  %2539 = vmatpush3.msra.mxu0 %v3322_v1  ;;  %2934 = vrcp.f32 %v962_v28 }
 0x187   : > { %v2911_v11 = vpop.eup %2910  ;;  %2540 = vmatprep.subr.mxu0 %v3333_v10  ;;  %2780 = vmatprep.subr.mxu1 %v3293_v46  ;;  %2936 = vrcp.f32 %v965_v34  ;;  %v1035_v34 = vld [vmem:[%s3137_s26 + $0x18] sm:$0xff] }
 0x188   : > { %v2913_v17 = vpop.eup %2912  ;;  %2541 = vmatpush3.msra.mxu0 %v3333_v10  ;;  %2796 = vmatpush3.msra.mxu1 %v3293_v46  ;;  %2938 = vrcp.f32 %v964_v36 }
 0x189   : > { %1111 = vperm.xlu1 %2879, %v2897_v35   ;;  %v2915_v22 = vpop.eup %2914  ;;  %2542 = vmatprep.subr.mxu0 %v3343_v14  ;;  %2940 = vrcp.f32 %v967_v41 }
 0x18a   : > { %1106 = vperm.xlu0 %2878, %v2899_v39   ;;  %2543 = vmatpush3.msra.mxu0 %v3343_v14  ;;  %v2917_v27 = vpop.eup %2916  ;;  %2942 = vrcp.f32 %v966_v44  ;;  %v1038_v44 = vld [vmem:[%s3137_s26 + $0x30] sm:$0xff] }
 0x18b   : > { %2544 = vmatprep.subr.mxu0 %v3355_v20  ;;  %v2919_v31 = vpop.eup %2918  ;;  %2781 = vmatprep.subr.mxu1 %v3302_v52 }
 0x18c   : > { %2545 = vmatpush3.msra.mxu0 %v3355_v20  ;;  %v2921_v35 = vpop.eup %2920  ;;  %2797 = vmatpush3.msra.mxu1 %v3302_v52 }
 0x18d   : > { %1121 = vperm.xlu1 %2879, %v2901_v43   ;;  %2546 = vmatprep.subr.mxu0 %v1288_v25  ;;  %v2923_v39 = vpop.eup %2922 }
 0x18e   : > { %1116 = vperm.xlu0 %2878, %v2903_v47   ;;  %2547 = vmatpush3.msra.mxu0 %v1288_v25  ;;  %v2925_v43 = vpop.eup %2924 }
 0x18f   : > { %2782 = vmatprep.subr.mxu1 %v3313_v60  ;;  %v2927_v46 = vpop.eup %2926 }
 0x190   : > { %2798 = vmatpush3.msra.mxu1 %v3313_v60  ;;  %v2929_v47 = vpop.eup %2928 }
 0x191   : > { %1131 = vperm.xlu1 %2879, %v2905_v54   ;;  %2783 = vmatprep.subr.mxu1 %v3322_v1  ;;  %v2931_v52 = vpop.eup %2930 }
 0x192   : > { %1126 = vperm.xlu0 %2878, %v2907_v61   ;;  %2799 = vmatpush3.msra.mxu1 %v3322_v1  ;;  %v2933_v53 = vpop.eup %2932 }
 0x193   : > { %2784 = vmatprep.subr.mxu1 %v3333_v10  ;;  %v2935_v54 = vpop.eup %2934 }
 0x194   : > { %2800 = vmatpush3.msra.mxu1 %v3333_v10  ;;  %v2937_v55 = vpop.eup %2936  ;;  %v1032_v10 = vld [vmem:[%s3137_s26] sm:$0xff] }
 0x195   : > { %1141 = vperm.xlu1 %2879, %v2909_v5   ;;  %2785 = vmatprep.subr.mxu1 %v3343_v14  ;;  %v2939_v60 = vpop.eup %2938 }
 0x196   : > { %1136 = vperm.xlu0 %2878, %v2911_v11   ;;  %2801 = vmatpush3.msra.mxu1 %v3343_v14  ;;  %v2941_v61 = vpop.eup %2940 }
 0x197   : > { %2786 = vmatprep.subr.mxu1 %v3355_v20  ;;  %v2943_v1 = vpop.eup %2942 }
 0x198   : > { %2802 = vmatpush3.msra.mxu1 %v3355_v20  ;;  %v1033_v20 = vld [vmem:[%s3137_s26 + $0x8] sm:$0xff] }
 0x199   : > { %1151 = vperm.xlu1 %2879, %v2913_v17   ;;  %2787 = vmatprep.subr.mxu1 %v1288_v25 }
 0x19a   : > { %1146 = vperm.xlu0 %2878, %v2915_v22   ;;  %2803 = vmatpush3.msra.mxu1 %v1288_v25 }
 0x19b   : > { %2596 = vmatprep.subr.mxu1 %v3401_v4 }
 0x19d   : > { %1161 = vperm.xlu1 %2879, %v2917_v27  }
 0x19e   : > { %1156 = vperm.xlu0 %2878, %v2919_v31  }
 0x1a1   : > { %1171 = vperm.xlu1 %2879, %v2921_v35   ;;  %v1036_v35 = vld [vmem:[%s3137_s26 + $0x20] sm:$0xff] }
 0x1a2   : > { %1166 = vperm.xlu0 %2878, %v2923_v39  }
 0x1a5   : > { %1181 = vperm.xlu1 %2879, %v2925_v43   ;;  %v1037_v43 = vld [vmem:[%s3137_s26 + $0x28] sm:$0xff] }
 0x1a6   : > { %1176 = vperm.xlu0 %2878, %v2927_v46  }
 0x1a9   : > { %1191 = vperm.xlu1 %2879, %v2929_v47  }
 0x1aa   : > { %1186 = vperm.xlu0 %2878, %v2931_v52  }
 0x1ad   : > { %1201 = vperm.xlu1 %2879, %v2933_v53  }
 0x1ae   : > { %1196 = vperm.xlu0 %2878, %v2935_v54   ;;  %v1039_v54 = vld [vmem:[%s3137_s26 + $0x38] sm:$0xff] }
 0x1b1   : > { %1211 = vperm.xlu1 %2879, %v2937_v55   ;;  %v1040_v55 = vld [vmem:[%s3137_s26 + $0x40] sm:$0xff] }
 0x1b2   : > { %1206 = vperm.xlu0 %2878, %v2939_v60  }
 0x1b5   : > { %1221 = vperm.xlu1 %2879, %v2941_v61  }
 0x1b6   : > { %1216 = vperm.xlu0 %2878, %v2943_v1  }
 0x1f4   : > { %v1077_v5 = vpop.permute.xlu1 %1076 }
 0x1f5   : > { %v1067_v8 = vpop.permute.xlu0 %1066  ;;  %v1226_v14 = vmul.f32 %v1077_v5, %v3194_v49 }
 0x1f6   : > { %v1224_v11 = vmul.f32 %v1067_v8, %v3196_v50  ;;  %v1041_v8 = vld [vmem:[%s3137_s26 + $0x48] sm:$0xff] }
 0x1f7   : > { %v1258_v26 = vadd.f32 %v1226_v14, %v1034_v16 }
 0x1f8   : > { %v1082_v17 = vpop.permute.xlu1 %1081  ;;  %v1256_v18 = vadd.f32 %v1224_v11, %v1032_v10  ;;  %v1042_v10 = vld [vmem:[%s3137_s26 + $0x50] sm:$0xff] }
 0x1f9   : > { %v1072_v22 = vpop.permute.xlu0 %1071  ;;  %v1227_v27 = vmul.f32 %v1082_v17, %v3198_v51 }
 0x1fa   : > { %v1225_v25 = vmul.f32 %v1072_v22, %v3203_v56  ;;  %2548 = vmatprep.mubr.f32.mxu0 %v1256_v18  ;;  %v1043_v18 = vld [vmem:[%s3137_s26 + $0x58] sm:$0xff] }
 0x1fb   : > { %v1259_v36 = vadd.f32 %v1227_v27, %v1035_v34 }
 0x1fc   : > { %v1257_v28 = vadd.f32 %v1225_v25, %v1033_v20  ;;  %v1092_v31 = vpop.permute.xlu1 %1091  ;;  %v1044_v20 = vld [vmem:[%s3137_s26 + $0x60] sm:$0xff] }
 0x1fd   : > { %v1087_v50 = vpop.permute.xlu0 %1086  ;;  %v1229_v56 = vmul.f32 %v1092_v31, %v3205_v57  ;;  %v1046_v31 = vld [vmem:[%s3137_s26 + $0x70] sm:$0xff] }
 0x1fe   : > { %v1228_v49 = vmul.f32 %v1087_v50, %v3208_v59  ;;  %2549 = vmatmul.mubr.f32.vlgmr.msra.gmra.mxu0 %v1257_v28  ;;  %v1045_v28 = vld [vmem:[%s3137_s26 + $0x68] sm:$0xff] }
 0x1ff   : > { %2551 = vmatprep.mubr.f32.mxu0 %v1258_v26  ;;  %v1261_v47 = vadd.f32 %v1229_v56, %v1037_v43  ;;  %v1047_v56 = vld [vmem:[%s3137_s26 + $0x78] sm:$0xff] }
 0x200   : > { %v1260_v39 = vadd.f32 %v1228_v49, %v1036_v35  ;;  %v1102_v41 = vpop.permute.xlu1 %1101  ;;  %v1049_v49 = vld [vmem:[%s3137_s26 + $0x88] sm:$0xff] }
 0x201   : > { %v1097_v46 = vpop.permute.xlu0 %1096  ;;  %v1231_v59 = vmul.f32 %v1102_v41, %v3212_v62  ;;  %v1048_v41 = vld [vmem:[%s3137_s26 + $0x80] sm:$0xff] }
 0x202   : > { %v1230_v51 = vmul.f32 %v1097_v46, %v3214_v63  ;;  %2552 = vmatmul.mubr.f32.gmra.mxu0 %v1259_v36  ;;  %v1051_v46 = vld [vmem:[%s3137_s26 + $0x98] sm:$0xff] }
 0x203   : > { %2554 = vmatprep.mubr.f32.mxu0 %v1260_v39  ;;  %v1263_v61 = vadd.f32 %v1231_v59, %v1039_v54  ;;  %v1050_v59 = vld [vmem:[%s3137_s26 + $0x90] sm:$0xff] }
 0x204   : > { %v1262_v52 = vadd.f32 %v1230_v51, %v1038_v44  ;;  %v1112_v53 = vpop.permute.xlu1 %1111 }
 0x205   : > { %v1107_v60 = vpop.permute.xlu0 %1106  ;;  %v1233_v63 = vmul.f32 %v1112_v53, %v3218_v2 }
 0x206   : > { %v1232_v57 = vmul.f32 %v1107_v60, %v3220_v3  ;;  %2555 = vmatmul.mubr.f32.gmra.mxu0 %v1261_v47 }
 0x207   : > { %2557 = vmatprep.mubr.f32.mxu0 %v1262_v52  ;;  %v1265_v14 = vadd.f32 %v1233_v63, %v1041_v8  ;;  %v1055_v8 = vld [vmem:[%s3137_s26 + $0xb8] sm:$0xff] }
 0x208   : > { %v1264_v1 = vadd.f32 %v1232_v57, %v1040_v55  ;;  %v1122_v5 = vpop.permute.xlu1 %1121  ;;  %v1053_v55 = vld [vmem:[%s3137_s26 + $0xa8] sm:$0xff]  ;;  %v1052_v57 = vld [vmem:[%s3137_s26 + $0xa0] sm:$0xff] }
 0x209   : > { %v1117_v11 = vpop.permute.xlu0 %1116  ;;  %v1235_v3 = vmul.f32 %v1122_v5, %v3224_v6 }
 0x20a   : > { %v1234_v62 = vmul.f32 %v1117_v11, %v3226_v7  ;;  %2558 = vmatmul.mubr.f32.gmra.mxu0 %v1263_v61  ;;  %v1054_v11 = vld [vmem:[%s3137_s26 + $0xb0] sm:$0xff] }
 0x20b   : > { %2560 = vmatprep.mubr.f32.mxu0 %v1264_v1  ;;  %v1267_v25 = vadd.f32 %v1235_v3, %v1043_v18  ;;  %v1580_v1 = vld [vmem:[%s3731_s5 + $0x60] sm:$0xff]  ;;  %v1578_v3 = vld [vmem:[%s3731_s5 + $0x50] sm:$0xff]  ;;  %v1057_v18 = vld [vmem:[%s3137_s26 + $0xc8] sm:$0xff] }
 0x20c   : > { %v1266_v16 = vadd.f32 %v1234_v62, %v1042_v10  ;;  %v1132_v17 = vpop.permute.xlu1 %1131 }
 0x20d   : > { %v1127_v22 = vpop.permute.xlu0 %1126  ;;  %v1237_v7 = vmul.f32 %v1132_v17, %v3230_v13 }
 0x20e   : > { %v1236_v2 = vmul.f32 %v1127_v22, %v3232_v15  ;;  %2561 = vmatmul.mubr.f32.gmra.mxu0 %v1265_v14  ;;  %v1056_v22 = vld [vmem:[%s3137_s26 + $0xc0] sm:$0xff] }
 0x20f   : > { %2563 = vmatprep.mubr.f32.mxu0 %v1266_v16  ;;  %v1269_v35 = vadd.f32 %v1237_v7, %v1045_v28  ;;  %v1576_v7 = vld [vmem:[%s3731_s5 + $0x40] sm:$0xff]  ;;  %v1059_v28 = vld [vmem:[%s3137_s26 + $0xd8] sm:$0xff] }
 0x210   : > { %v1268_v26 = vadd.f32 %v1236_v2, %v1044_v20  ;;  %v1142_v27 = vpop.permute.xlu1 %1141 }
 0x211   : > { %v1137_v6 = vpop.permute.xlu0 %1136  ;;  %v1239_v15 = vmul.f32 %v1142_v27, %v3242_v21 }
 0x212   : > { %v1238_v34 = vmul.f32 %v1137_v6, %v3247_v24  ;;  %2564 = vmatmul.mubr.f32.gmra.mxu0 %v1267_v25  ;;  %v1058_v6 = vld [vmem:[%s3137_s26 + $0xd0] sm:$0xff] }
 0x213   : > { %2566 = vmatprep.mubr.f32.mxu0 %v1268_v26  ;;  %v1271_v24 = vadd.f32 %v1239_v15, %v1047_v56  ;;  %v1574_v15 = vld [vmem:[%s3731_s5 + $0x30] sm:$0xff] }
 0x214   : > { %v1270_v50 = vadd.f32 %v1238_v34, %v1046_v31  ;;  %v1152_v36 = vpop.permute.xlu1 %1151 }
 0x215   : > { %v1241_v13 = vmul.f32 %v1152_v36, %v3254_v29  ;;  %v1147_v39 = vpop.permute.xlu0 %1146  ;;  %v1582_v29 = vld [vmem:[%s3731_s5 + $0x70] sm:$0xff]  ;;  %v1061_v36 = vld [vmem:[%s3137_s26 + $0xe8] sm:$0xff] }
 0x216   : > { %v1240_v43 = vmul.f32 %v1147_v39, %v3259_v32  ;;  %2567 = vmatmul.mubr.f32.gmra.mxu0 %v1269_v35 }
 0x217   : > { %v1273_v44 = vadd.f32 %v1241_v13, %v1049_v49  ;;  %2569 = vmatprep.mubr.f32.mxu0 %v1270_v50  ;;  %v1060_v13 = vld [vmem:[%s3137_s26 + $0xe0] sm:$0xff] }
 0x218   : > { %v1162_v51 = vpop.permute.xlu1 %1161  ;;  %v1272_v47 = vadd.f32 %v1240_v43, %v1048_v41  ;;  %v1572_v43 = vld [vmem:[%s3731_s5 + $0x20] sm:$0xff] }
 0x219   : > { %v1243_v21 = vmul.f32 %v1162_v51, %v3268_v37  ;;  %v1157_v52 = vpop.permute.xlu0 %1156  ;;  %v1581_v37 = vld [vmem:[%s3731_s5 + $0x68] sm:$0xff] }
 0x21a   : > { %v1242_v53 = vmul.f32 %v1157_v52, %v3275_v40  ;;  %2570 = vmatmul.mubr.f32.gmra.mxu0 %v1271_v24  ;;  %2572 = vmatprep.mubr.f32.mxu1 %v1272_v47 }
 0x21b   : > { %v1275_v32 = vadd.f32 %v1243_v21, %v1051_v46  ;;  %2573 = vmatmul.mubr.f32.vlgmr.msra.gmra.mxu1 %v1273_v44  ;;  %v1063_v46 = vld [vmem:[%s3137_s26 + $0xf8] sm:$0xff] }
 0x21c   : > { %v1274_v54 = vadd.f32 %v1242_v53, %v1050_v59  ;;  %v1172_v60 = vpop.permute.xlu1 %1171  ;;  %2597 = vmatpush3.msra.mxu1 %v3401_v4 }
 0x21d   : > { %v1245_v40 = vmul.f32 %v1172_v60, %v3287_v45  ;;  %v1167_v61 = vpop.permute.xlu0 %1166  ;;  %2598 = vmatprep.subr.mxu1 %v1582_v29  ;;  %v1579_v45 = vld [vmem:[%s3731_s5 + $0x58] sm:$0xff]  ;;  %v1860_v60 = vld [vmem:[%s3733_s7 + $0x60] sm:$0xff] }
 0x21e   : > { %v1244_v63 = vmul.f32 %v1167_v61, %v3295_v48  ;;  %2575 = vmatprep.mubr.f32.mxu1 %v1274_v54  ;;  %2599 = vmatpush3.msra.mxu1 %v1582_v29  ;;  %v1570_v29 = vld [vmem:[%s3731_s5 + $0x10] sm:$0xff]  ;;  %v1856_v61 = vld [vmem:[%s3733_s7 + $0x40] sm:$0xff] }
 0x21f   : > { %v1277_v5 = vadd.f32 %v1245_v40, %v1053_v55  ;;  %2576 = vmatmul.mubr.f32.gmra.mxu1 %v1275_v32  ;;  %2600 = vmatprep.subr.mxu1 %v1581_v37  ;;  %v1863_v32 = vld [vmem:[%s3733_s7 + $0x78] sm:$0xff]  ;;  %v1862_v54 = vld [vmem:[%s3733_s7 + $0x70] sm:$0xff]  ;;  %v1861_v55 = vld [vmem:[%s3733_s7 + $0x68] sm:$0xff] }
 0x220   : > { %v1276_v4 = vadd.f32 %v1244_v63, %v1052_v57  ;;  %v1182_v10 = vpop.permute.xlu1 %1181  ;;  %2601 = vmatpush3.msra.mxu1 %v1581_v37  ;;  %2676 = vmatprep.subr.mxu0 %v1863_v32  ;;  %v1859_v37 = vld [vmem:[%s3733_s7 + $0x58] sm:$0xff]  ;;  %v1858_v40 = vld [vmem:[%s3733_s7 + $0x50] sm:$0xff]  ;;  %v1857_v57 = vld [vmem:[%s3733_s7 + $0x48] sm:$0xff] }
 0x221   : > { %v1247_v48 = vmul.f32 %v1182_v10, %v3307_v58  ;;  %v1177_v62 = vpop.permute.xlu0 %1176  ;;  %2602 = vmatprep.subr.mxu1 %v1580_v1  ;;  %v1577_v58 = vld [vmem:[%s3731_s5 + $0x48] sm:$0xff]  ;;  %2677 = vmatpush3.msra.mxu0 %v1863_v32  ;;  %v1855_v63 = vld [vmem:[%s3733_s7 + $0x38] sm:$0xff]  ;;  %v3556_v10 = vld [vmem:[%s3730_s4] ss:$0 sm:$0xff] }
 0x222   : > { %v1246_v14 = vmul.f32 %v1177_v62, %v3315_v0  ;;  %2578 = vmatprep.mubr.f32.mxu1 %v1276_v4  ;;  %2603 = vmatpush3.msra.mxu1 %v1580_v1  ;;  %v1854_v1 = vld [vmem:[%s3733_s7 + $0x30] sm:$0xff]  ;;  %v1852_v4 = vld [vmem:[%s3733_s7 + $0x20] sm:$0xff] }
 0x223   : > { %v1279_v16 = vadd.f32 %v1247_v48, %v1055_v8  ;;  %2579 = vmatmul.mubr.f32.gmra.mxu1 %v1277_v5  ;;  %2604 = vmatprep.subr.mxu1 %v1579_v45  ;;  %v1853_v5 = vld [vmem:[%s3733_s7 + $0x28] sm:$0xff]  ;;  %v1851_v8 = vld [vmem:[%s3733_s7 + $0x18] sm:$0xff] }
 0x224   : > { %v1278_v17 = vadd.f32 %v1246_v14, %v1054_v11  ;;  %v1192_v20 = vpop.permute.xlu1 %1191  ;;  %2605 = vmatpush3.msra.mxu1 %v1579_v45  ;;  %2678 = vmatprep.subr.mxu0 %v1862_v54 }
 0x225   : > { %v1249_v0 = vmul.f32 %v1192_v20, %v3327_v9  ;;  %v1187_v2 = vpop.permute.xlu0 %1186  ;;  %2606 = vmatprep.subr.mxu1 %v1578_v3  ;;  %v1575_v9 = vld [vmem:[%s3731_s5 + $0x38] sm:$0xff]  ;;  %2679 = vmatpush3.msra.mxu0 %v1862_v54 }
 0x226   : > { %v1248_v25 = vmul.f32 %v1187_v2, %v3335_v12  ;;  %2581 = vmatprep.mubr.f32.mxu1 %v1278_v17  ;;  %2607 = vmatpush3.msra.mxu1 %v1578_v3 }
 0x227   : > { %v1281_v26 = vadd.f32 %v1249_v0, %v1057_v18  ;;  %2582 = vmatmul.mubr.f32.gmra.mxu1 %v1279_v16  ;;  %2608 = vmatprep.subr.mxu1 %v1577_v58 }
 0x228   : > { %v1280_v27 = vadd.f32 %v1248_v25, %v1056_v22  ;;  %v1202_v31 = vpop.permute.xlu1 %1201  ;;  %2609 = vmatpush3.msra.mxu1 %v1577_v58  ;;  %2680 = vmatprep.subr.mxu0 %v1861_v55 }
 0x229   : > { %v1251_v12 = vmul.f32 %v1202_v31, %v3349_v19  ;;  %v1197_v34 = vpop.permute.xlu0 %1196  ;;  %2610 = vmatprep.subr.mxu1 %v1576_v7  ;;  %v1573_v19 = vld [vmem:[%s3731_s5 + $0x28] sm:$0xff]  ;;  %2681 = vmatpush3.msra.mxu0 %v1861_v55 }
 0x22a   : > { %v1250_v35 = vmul.f32 %v1197_v34, %v3357_v23  ;;  %2584 = vmatprep.mubr.f32.mxu1 %v1280_v27  ;;  %2611 = vmatpush3.msra.mxu1 %v1576_v7 }
 0x22b   : > { %v1283_v50 = vadd.f32 %v1251_v12, %v1059_v28  ;;  %2585 = vmatmul.mubr.f32.gmra.mxu1 %v1281_v26  ;;  %2612 = vmatprep.subr.mxu1 %v1575_v9 }
 0x22c   : > { %v1282_v49 = vadd.f32 %v1250_v35, %v1058_v6  ;;  %v1212_v56 = vpop.permute.xlu1 %1211  ;;  %2613 = vmatpush3.msra.mxu1 %v1575_v9  ;;  %2682 = vmatprep.subr.mxu0 %v1860_v60 }
 0x22d   : > { %v1253_v23 = vmul.f32 %v1212_v56, %v3369_v30  ;;  %v1207_v39 = vpop.permute.xlu0 %1206  ;;  %2614 = vmatprep.subr.mxu1 %v1574_v15  ;;  %v1571_v30 = vld [vmem:[%s3731_s5 + $0x18] sm:$0xff]  ;;  %2683 = vmatpush3.msra.mxu0 %v1860_v60 }
 0x22e   : > { %v1252_v41 = vmul.f32 %v1207_v39, %v3372_v33  ;;  %2587 = vmatprep.mubr.f32.mxu1 %v1282_v49  ;;  %2615 = vmatpush3.msra.mxu1 %v1574_v15  ;;  %v1062_v33 = vld [vmem:[%s3137_s26 + $0xf0] sm:$0xff] }
 0x22f   : > { %v1285_v44 = vadd.f32 %v1253_v23, %v1061_v36  ;;  %2588 = vmatmul.mubr.f32.gmra.mxu1 %v1283_v50  ;;  %2616 = vmatprep.subr.mxu1 %v1573_v19 }
 0x230   : > { %v1284_v24 = vadd.f32 %v1252_v41, %v1060_v13  ;;  %v1222_v51 = vpop.permute.xlu1 %1221  ;;  %2617 = vmatpush3.msra.mxu1 %v1573_v19  ;;  %2684 = vmatprep.subr.mxu0 %v1859_v37 }
 0x231   : > { %v1255_v47 = vmul.f32 %v1222_v51, %v3379_v38  ;;  %v1217_v21 = vpop.permute.xlu0 %1216  ;;  %2618 = vmatprep.subr.mxu1 %v1572_v43  ;;  %v1569_v38 = vld [vmem:[%s3731_s5 + $0x8] sm:$0xff]  ;;  %2685 = vmatpush3.msra.mxu0 %v1859_v37 }
 0x232   : > { %v1254_v59 = vmul.f32 %v1217_v21, %v3382_v42  ;;  %2590 = vmatprep.mubr.f32.mxu1 %v1284_v24  ;;  %2619 = vmatpush3.msra.mxu1 %v1572_v43  ;;  %v1568_v42 = vld [vmem:[%s3731_s5] sm:$0xff] }
 0x233   : > { %v1287_v52 = vadd.f32 %v1255_v47, %v1063_v46  ;;  %2591 = vmatmul.mubr.f32.gmra.mxu1 %v1285_v44  ;;  %2620 = vmatprep.subr.mxu1 %v1571_v30 }
 0x234   : > { %v1286_v53 = vadd.f32 %v1254_v59, %v1062_v33  ;;  %2621 = vmatpush3.msra.mxu1 %v1571_v30  ;;  %2686 = vmatprep.subr.mxu0 %v1858_v40 }
 0x235   : > { %2622 = vmatprep.subr.mxu1 %v1570_v29  ;;  %2687 = vmatpush3.msra.mxu0 %v1858_v40 }
 0x236   : > { %2593 = vmatprep.mubr.f32.mxu1 %v1286_v53  ;;  %2623 = vmatpush3.msra.mxu1 %v1570_v29 }
 0x237   : > { %2594 = vmatmul.mubr.f32.gmra.mxu1 %v1287_v52  ;;  %2624 = vmatprep.subr.mxu1 %v1569_v38 }
 0x238   : > { %2625 = vmatpush3.msra.mxu1 %v1569_v38  ;;  %2688 = vmatprep.subr.mxu0 %v1857_v57 }
 0x239   : > { %2626 = vmatprep.subr.mxu1 %v1568_v42  ;;  %2689 = vmatpush3.msra.mxu0 %v1857_v57 }
 0x23a   : > { %2627 = vmatpush3.msra.mxu1 %v1568_v42  ;;  %2690 = vmatprep.subr.mxu0 %v1856_v61 }
 0x23b   : > { %2691 = vmatpush3.msra.mxu0 %v1856_v61 }
 0x23c   : > { %2692 = vmatprep.subr.mxu0 %v1855_v63 }
 0x23d   : > { %2693 = vmatpush3.msra.mxu0 %v1855_v63 }
 0x23e   : > { %2694 = vmatprep.subr.mxu0 %v1854_v1 }
 0x23f   : > { %2695 = vmatpush3.msra.mxu0 %v1854_v1 }
 0x240   : > { %2696 = vmatprep.subr.mxu0 %v1853_v5 }
 0x241   : > { %2697 = vmatpush3.msra.mxu0 %v1853_v5 }
 0x242   : > { %2698 = vmatprep.subr.mxu0 %v1852_v4 }
 0x243   : > { %2699 = vmatpush3.msra.mxu0 %v1852_v4 }
 0x244   : > { %2700 = vmatprep.subr.mxu0 %v1851_v8 }
 0x245   : > { %2701 = vmatpush3.msra.mxu0 %v1851_v8 }
 0x2be   : > { %v2550_v45 = vpop.f32.mrf.mxu0 }
 0x2bf   : > { %v1383_v48 = vadd.f32 %v2550_v45, %v3556_v10 }
 0x2c0   : > { %v1377_v11 = vpop.f32.mrf.mxu0 }
 0x2c1   : > { %v1378_v62 = vadd.f32 %v3556_v10, %v1377_v11  ;;  %v1537_v16 = vmax.f32 %v1383_v48, 0.0 }
 0x2c2   : > { %v2553_v14 = vpop.f32.mrf.mxu0 }
 0x2c3   : > { %v1536_v3 = vmax.f32 %v1378_v62, 0.0  ;;  %v1393_v17 = vadd.f32 %v2553_v14, %v3556_v10 }
 0x2c4   : > { %v1387_v18 = vpop.f32.mrf.mxu0 }
 0x2c5   : > { %v1388_v20 = vadd.f32 %v3556_v10, %v1387_v18  ;;  %2628 = vmatprep.mubr.f32.mxu1 %v1536_v3  ;;  %v1539_v22 = vmax.f32 %v1393_v17, 0.0 }
 0x2c6   : > { %v2556_v58 = vpop.f32.mrf.mxu0  ;;  %2629 = vmatmul.mubr.f32.vlgmr.msra.gmra.mxu1 %v1537_v16 }
 0x2c7   : > { %v1538_v0 = vmax.f32 %v1388_v20, 0.0  ;;  %v1403_v2 = vadd.f32 %v2556_v58, %v3556_v10 }
 0x2c8   : > { %v1397_v25 = vpop.f32.mrf.mxu0 }
 0x2c9   : > { %v1398_v7 = vadd.f32 %v3556_v10, %v1397_v25  ;;  %2631 = vmatprep.mubr.f32.mxu1 %v1538_v0  ;;  %v1541_v28 = vmax.f32 %v1403_v2, 0.0 }
 0x2ca   : > { %v2559_v26 = vpop.f32.mrf.mxu0  ;;  %2632 = vmatmul.mubr.f32.gmra.mxu1 %v1539_v22 }
 0x2cb   : > { %v1540_v27 = vmax.f32 %v1398_v7, 0.0  ;;  %v1413_v31 = vadd.f32 %v2559_v26, %v3556_v10 }
 0x2cc   : > { %v1407_v9 = vpop.f32.mrf.mxu0 }
 0x2cd   : > { %v1408_v12 = vadd.f32 %v3556_v10, %v1407_v9  ;;  %2634 = vmatprep.mubr.f32.mxu1 %v1540_v27  ;;  %v1543_v35 = vmax.f32 %v1413_v31, 0.0 }
 0x2ce   : > { %v2562_v6 = vpop.f32.mrf.mxu0  ;;  %2635 = vmatmul.mubr.f32.gmra.mxu1 %v1541_v28 }
 0x2cf   : > { %v1542_v34 = vmax.f32 %v1408_v12, 0.0  ;;  %v1423_v15 = vadd.f32 %v2562_v6, %v3556_v10 }
 0x2d0   : > { %v1417_v50 = vpop.f32.mrf.mxu0 }
 0x2d1   : > { %v1418_v49 = vadd.f32 %v3556_v10, %v1417_v50  ;;  %2637 = vmatprep.mubr.f32.mxu1 %v1542_v34  ;;  %v1545_v19 = vmax.f32 %v1423_v15, 0.0 }
 0x2d2   : > { %v2565_v36 = vpop.f32.mrf.mxu0  ;;  %2638 = vmatmul.mubr.f32.gmra.mxu1 %v1543_v35 }
 0x2d3   : > { %v1544_v56 = vmax.f32 %v1418_v49, 0.0  ;;  %v1433_v23 = vadd.f32 %v2565_v36, %v3556_v10 }
 0x2d4   : > { %v1427_v13 = vpop.f32.mrf.mxu0 }
 0x2d5   : > { %v1428_v39 = vadd.f32 %v3556_v10, %v1427_v13  ;;  %2640 = vmatprep.mubr.f32.mxu1 %v1544_v56  ;;  %v1547_v44 = vmax.f32 %v1433_v23, 0.0 }
 0x2d6   : > { %v2568_v41 = vpop.f32.mrf.mxu0  ;;  %2641 = vmatmul.mubr.f32.gmra.mxu1 %v1545_v19 }
 0x2d7   : > { %v1546_v43 = vmax.f32 %v1428_v39, 0.0  ;;  %v1443_v24 = vadd.f32 %v2568_v41, %v3556_v10  ;;  %v1850_v39 = vld [vmem:[%s3733_s7 + $0x10] sm:$0xff]  ;;  %v1849_v41 = vld [vmem:[%s3733_s7 + $0x8] sm:$0xff] }
 0x2d8   : > { %v1437_v46 = vpop.f32.mrf.mxu0  ;;  %2702 = vmatprep.subr.mxu0 %v1850_v39 }
 0x2d9   : > { %v1438_v51 = vadd.f32 %v3556_v10, %v1437_v46  ;;  %2643 = vmatprep.mubr.f32.mxu1 %v1546_v43  ;;  %v1549_v21 = vmax.f32 %v1443_v24, 0.0  ;;  %2703 = vmatpush3.msra.mxu0 %v1850_v39  ;;  %v3602_v43 = vld [vmem:[%s3732_s6] ss:$0 sm:$0xff] }
 0x2da   : > { %v2571_v30 = vpop.f32.mrf.mxu0  ;;  %2644 = vmatmul.mubr.f32.gmra.mxu1 %v1547_v44  ;;  %2704 = vmatprep.subr.mxu0 %v1849_v41 }
 0x2db   : > { %v1548_v47 = vmax.f32 %v1438_v51, 0.0  ;;  %v2574_v33 = vpop.f32.mrf.mxu1  ;;  %v1453_v59 = vadd.f32 %v2571_v30, %v3556_v10  ;;  %2705 = vmatpush3.msra.mxu0 %v1849_v41 }
 0x2dc   : > { %v1447_v52 = vpop.f32.mrf.mxu0  ;;  %v1463_v55 = vadd.f32 %v2574_v33, %v3556_v10 }
 0x2dd   : > { %v1448_v53 = vadd.f32 %v3556_v10, %v1447_v52  ;;  %v1457_v29 = vpop.f32.mrf.mxu1  ;;  %2646 = vmatprep.mubr.f32.mxu1 %v1548_v47  ;;  %v1551_v54 = vmax.f32 %v1453_v59, 0.0 }
 0x2de   : > { %v1458_v38 = vadd.f32 %v3556_v10, %v1457_v29  ;;  %2647 = vmatmul.mubr.f32.gmra.mxu1 %v1549_v21  ;;  %v1553_v61 = vmax.f32 %v1463_v55, 0.0 }
 0x2df   : > { %v1550_v42 = vmax.f32 %v1448_v53, 0.0  ;;  %v2577_v32 = vpop.f32.mrf.mxu1 }
 0x2e0   : > { %v1552_v60 = vmax.f32 %v1458_v38, 0.0  ;;  %v1473_v63 = vadd.f32 %v2577_v32, %v3556_v10 }
 0x2e1   : > { %v1467_v37 = vpop.f32.mrf.mxu1  ;;  %2649 = vmatprep.mubr.f32.mxu1 %v1550_v42 }
 0x2e2   : > { %v1468_v40 = vadd.f32 %v3556_v10, %v1467_v37  ;;  %2650 = vmatmul.mubr.f32.gmra.mxu1 %v1551_v54  ;;  %v1555_v45 = vmax.f32 %v1473_v63, 0.0 }
 0x2e3   : > { %v2580_v57 = vpop.f32.mrf.mxu1  ;;  %2652 = vmatprep.mubr.f32.mxu1 %v1552_v60 }
 0x2e4   : > { %v1554_v1 = vmax.f32 %v1468_v40, 0.0  ;;  %v1483_v48 = vadd.f32 %v2580_v57, %v3556_v10 }
 0x2e5   : > { %v1477_v5 = vpop.f32.mrf.mxu1 }
 0x2e6   : > { %v1478_v4 = vadd.f32 %v3556_v10, %v1477_v5  ;;  %2653 = vmatmul.mubr.f32.gmra.mxu1 %v1553_v61  ;;  %v1557_v16 = vmax.f32 %v1483_v48, 0.0 }
 0x2e7   : > { %v2583_v8 = vpop.f32.mrf.mxu1  ;;  %2655 = vmatprep.mubr.f32.mxu1 %v1554_v1 }
 0x2e8   : > { %v1556_v11 = vmax.f32 %v1478_v4, 0.0  ;;  %v1493_v17 = vadd.f32 %v2583_v8, %v3556_v10 }
 0x2e9   : > { %v1487_v62 = vpop.f32.mrf.mxu1 }
 0x2ea   : > { %v1488_v14 = vadd.f32 %v3556_v10, %v1487_v62  ;;  %2656 = vmatmul.mubr.f32.gmra.mxu1 %v1555_v45  ;;  %v1559_v22 = vmax.f32 %v1493_v17, 0.0 }
 0x2eb   : > { %v2586_v3 = vpop.f32.mrf.mxu1  ;;  %2658 = vmatprep.mubr.f32.mxu1 %v1556_v11 }
 0x2ec   : > { %v1558_v18 = vmax.f32 %v1488_v14, 0.0  ;;  %v1503_v2 = vadd.f32 %v2586_v3, %v3556_v10 }
 0x2ed   : > { %v1497_v20 = vpop.f32.mrf.mxu1 }
 0x2ee   : > { %v1498_v58 = vadd.f32 %v3556_v10, %v1497_v20  ;;  %2659 = vmatmul.mubr.f32.gmra.mxu1 %v1557_v16  ;;  %v1561_v28 = vmax.f32 %v1503_v2, 0.0 }
 0x2ef   : > { %v2589_v0 = vpop.f32.mrf.mxu1  ;;  %2661 = vmatprep.mubr.f32.mxu1 %v1558_v18 }
 0x2f0   : > { %v1560_v25 = vmax.f32 %v1498_v58, 0.0  ;;  %v1513_v31 = vadd.f32 %v2589_v0, %v3556_v10 }
 0x2f1   : > { %v1507_v7 = vpop.f32.mrf.mxu1 }
 0x2f2   : > { %v1508_v26 = vadd.f32 %v3556_v10, %v1507_v7  ;;  %2662 = vmatmul.mubr.f32.gmra.mxu1 %v1559_v22  ;;  %v1563_v35 = vmax.f32 %v1513_v31, 0.0 }
 0x2f3   : > { %v2592_v27 = vpop.f32.mrf.mxu1  ;;  %2664 = vmatprep.mubr.f32.mxu1 %v1560_v25 }
 0x2f4   : > { %v1562_v9 = vmax.f32 %v1508_v26, 0.0  ;;  %v1523_v15 = vadd.f32 %v2592_v27, %v3556_v10 }
 0x2f5   : > { %v1517_v12 = vpop.f32.mrf.mxu1 }
 0x2f6   : > { %v1518_v6 = vadd.f32 %v3556_v10, %v1517_v12  ;;  %2665 = vmatmul.mubr.f32.gmra.mxu1 %v1561_v28  ;;  %v1565_v56 = vmax.f32 %v1523_v15, 0.0 }
 0x2f7   : > { %v2595_v34 = vpop.f32.mrf.mxu1  ;;  %2667 = vmatprep.mubr.f32.mxu1 %v1562_v9 }
 0x2f8   : > { %v1564_v50 = vmax.f32 %v1518_v6, 0.0  ;;  %v1533_v19 = vadd.f32 %v2595_v34, %v3556_v10 }
 0x2f9   : > { %v1527_v49 = vpop.f32.mrf.mxu1 }
 0x2fa   : > { %v1528_v36 = vadd.f32 %v3556_v10, %v1527_v49  ;;  %2668 = vmatmul.mubr.f32.gmra.mxu1 %v1563_v35  ;;  %v1567_v13 = vmax.f32 %v1533_v19, 0.0  ;;  %v1848_v10 = vld [vmem:[%s3733_s7] sm:$0xff] }
 0x2fb   : > { %2670 = vmatprep.mubr.f32.mxu1 %v1564_v50  ;;  %2706 = vmatprep.subr.mxu0 %v1848_v10 }
 0x2fc   : > { %v1566_v23 = vmax.f32 %v1528_v36, 0.0  ;;  %2707 = vmatpush3.msra.mxu0 %v1848_v10 }
 0x2fe   : > { %2671 = vmatmul.mubr.f32.gmra.mxu1 %v1565_v56 }
 0x2ff   : > { %2673 = vmatprep.mubr.f32.mxu1 %v1566_v23 }
 0x302   : > { %2674 = vmatmul.mubr.f32.gmra.mxu1 %v1567_v13 }
 0x386   : > { %v2630_v44 = vpop.f32.mrf.mxu1 }
 0x387   : > { %v1663_v24 = vadd.f32 %v2630_v44, %v3602_v43 }
 0x388   : > { %v1657_v46 = vpop.f32.mrf.mxu1 }
 0x389   : > { %v1658_v51 = vadd.f32 %v3602_v43, %v1657_v46  ;;  %v1817_v33 = vmax.f32 %v1663_v24, 0.0 }
 0x38a   : > { %v2633_v30 = vpop.f32.mrf.mxu1 }
 0x38b   : > { %v1816_v47 = vmax.f32 %v1658_v51, 0.0  ;;  %v1673_v21 = vadd.f32 %v2633_v30, %v3602_v43 }
 0x38c   : > { %v1667_v59 = vpop.f32.mrf.mxu1 }
 0x38d   : > { %v1668_v52 = vadd.f32 %v3602_v43, %v1667_v59  ;;  %2708 = vmatprep.mubr.f32.mxu0 %v1816_v47  ;;  %v1819_v38 = vmax.f32 %v1673_v21, 0.0 }
 0x38e   : > { %v2636_v53 = vpop.f32.mrf.mxu1  ;;  %2709 = vmatmul.mubr.f32.vlgmr.msra.gmra.mxu0 %v1817_v33 }
 0x38f   : > { %v1818_v29 = vmax.f32 %v1668_v52, 0.0  ;;  %v1683_v42 = vadd.f32 %v2636_v53, %v3602_v43 }
 0x390   : > { %v1677_v32 = vpop.f32.mrf.mxu1 }
 0x391   : > { %v1678_v54 = vadd.f32 %v3602_v43, %v1677_v32  ;;  %2711 = vmatprep.mubr.f32.mxu0 %v1818_v29  ;;  %v1821_v37 = vmax.f32 %v1683_v42, 0.0 }
 0x392   : > { %v2639_v55 = vpop.f32.mrf.mxu1  ;;  %2712 = vmatmul.mubr.f32.gmra.mxu0 %v1819_v38 }
 0x393   : > { %v1820_v60 = vmax.f32 %v1678_v54, 0.0  ;;  %v1693_v40 = vadd.f32 %v2639_v55, %v3602_v43 }
 0x394   : > { %v1687_v57 = vpop.f32.mrf.mxu1 }
 0x395   : > { %v1688_v61 = vadd.f32 %v3602_v43, %v1687_v57  ;;  %2714 = vmatprep.mubr.f32.mxu0 %v1820_v60  ;;  %v1823_v5 = vmax.f32 %v1693_v40, 0.0 }
 0x396   : > { %v2642_v63 = vpop.f32.mrf.mxu1  ;;  %2715 = vmatmul.mubr.f32.gmra.mxu0 %v1821_v37 }
 0x397   : > { %v1822_v1 = vmax.f32 %v1688_v61, 0.0  ;;  %v1703_v4 = vadd.f32 %v2642_v63, %v3602_v43 }
 0x398   : > { %v1697_v8 = vpop.f32.mrf.mxu1 }
 0x399   : > { %v1698_v45 = vadd.f32 %v3602_v43, %v1697_v8  ;;  %2717 = vmatprep.mubr.f32.mxu0 %v1822_v1  ;;  %v1825_v62 = vmax.f32 %v1703_v4, 0.0 }
 0x39a   : > { %v2645_v48 = vpop.f32.mrf.mxu1  ;;  %2718 = vmatmul.mubr.f32.gmra.mxu0 %v1823_v5 }
 0x39b   : > { %v1824_v11 = vmax.f32 %v1698_v45, 0.0  ;;  %v1713_v14 = vadd.f32 %v2645_v48, %v3602_v43 }
 0x39c   : > { %v1707_v3 = vpop.f32.mrf.mxu1 }
 0x39d   : > { %v1708_v16 = vadd.f32 %v3602_v43, %v1707_v3  ;;  %2720 = vmatprep.mubr.f32.mxu0 %v1824_v11  ;;  %v1827_v20 = vmax.f32 %v1713_v14, 0.0 }
 0x39e   : > { %v2648_v17 = vpop.f32.mrf.mxu1  ;;  %2721 = vmatmul.mubr.f32.gmra.mxu0 %v1825_v62 }
 0x39f   : > { %v1826_v18 = vmax.f32 %v1708_v16, 0.0  ;;  %v1723_v58 = vadd.f32 %v2648_v17, %v3602_v43  ;;  %v3639_v16 = vld [vmem:[%s3734_s8] ss:$0 sm:$0xff] }
 0x3a0   : > { %v1717_v0 = vpop.f32.mrf.mxu1 }
 0x3a1   : > { %v1718_v22 = vadd.f32 %v3602_v43, %v1717_v0  ;;  %2723 = vmatprep.mubr.f32.mxu0 %v1826_v18  ;;  %v1829_v7 = vmax.f32 %v1723_v58, 0.0 }
 0x3a2   : > { %v2651_v2 = vpop.f32.mrf.mxu1  ;;  %2724 = vmatmul.mubr.f32.gmra.mxu0 %v1827_v20 }
 0x3a3   : > { %v1828_v25 = vmax.f32 %v1718_v22, 0.0  ;;  %v1733_v26 = vadd.f32 %v2651_v2, %v3602_v43 }
 0x3a4   : > { %v1727_v27 = vpop.f32.mrf.mxu1 }
 0x3a5   : > { %v1728_v28 = vadd.f32 %v3602_v43, %v1727_v27  ;;  %2726 = vmatprep.mubr.f32.mxu0 %v1828_v25  ;;  %v1831_v12 = vmax.f32 %v1733_v26, 0.0 }
 0x3a6   : > { %v2654_v31 = vpop.f32.mrf.mxu1  ;;  %2727 = vmatmul.mubr.f32.gmra.mxu0 %v1829_v7 }
 0x3a7   : > { %v1830_v9 = vmax.f32 %v1728_v28, 0.0  ;;  %v1743_v6 = vadd.f32 %v2654_v31, %v3602_v43 }
 0x3a8   : > { %v1737_v34 = vpop.f32.mrf.mxu1 }
 0x3a9   : > { %v1738_v35 = vadd.f32 %v3602_v43, %v1737_v34  ;;  %2729 = vmatprep.mubr.f32.mxu0 %v1830_v9  ;;  %v1833_v49 = vmax.f32 %v1743_v6, 0.0 }
 0x3aa   : > { %v2657_v15 = vpop.f32.mrf.mxu1  ;;  %2730 = vmatmul.mubr.f32.gmra.mxu0 %v1831_v12 }
 0x3ab   : > { %v1832_v50 = vmax.f32 %v1738_v35, 0.0  ;;  %v1753_v36 = vadd.f32 %v2657_v15, %v3602_v43 }
 0x3ac   : > { %v1747_v56 = vpop.f32.mrf.mxu1 }
 0x3ad   : > { %v1748_v19 = vadd.f32 %v3602_v43, %v1747_v56  ;;  %2732 = vmatprep.mubr.f32.mxu0 %v1832_v50  ;;  %v1835_v39 = vmax.f32 %v1753_v36, 0.0 }
 0x3ae   : > { %v2660_v23 = vpop.f32.mrf.mxu1  ;;  %2733 = vmatmul.mubr.f32.gmra.mxu0 %v1833_v49 }
 0x3af   : > { %v1834_v13 = vmax.f32 %v1748_v19, 0.0  ;;  %v1763_v41 = vadd.f32 %v2660_v23, %v3602_v43 }
 0x3b0   : > { %v1757_v10 = vpop.f32.mrf.mxu1 }
 0x3b1   : > { %v1758_v44 = vadd.f32 %v3602_v43, %v1757_v10  ;;  %2735 = vmatprep.mubr.f32.mxu0 %v1834_v13  ;;  %v1837_v51 = vmax.f32 %v1763_v41, 0.0 }
 0x3b2   : > { %v2663_v24 = vpop.f32.mrf.mxu1  ;;  %2736 = vmatmul.mubr.f32.gmra.mxu0 %v1835_v39 }
 0x3b3   : > { %v1836_v46 = vmax.f32 %v1758_v44, 0.0  ;;  %v1773_v30 = vadd.f32 %v2663_v24, %v3602_v43 }
 0x3b4   : > { %v1767_v47 = vpop.f32.mrf.mxu1 }
 0x3b5   : > { %v1768_v33 = vadd.f32 %v3602_v43, %v1767_v47  ;;  %2738 = vmatprep.mubr.f32.mxu0 %v1836_v46  ;;  %v1839_v52 = vmax.f32 %v1773_v30, 0.0 }
 0x3b6   : > { %v2666_v21 = vpop.f32.mrf.mxu1  ;;  %2739 = vmatmul.mubr.f32.gmra.mxu0 %v1837_v51 }
 0x3b7   : > { %v1838_v59 = vmax.f32 %v1768_v33, 0.0  ;;  %v1783_v53 = vadd.f32 %v2666_v21, %v3602_v43 }
 0x3b8   : > { %v1777_v29 = vpop.f32.mrf.mxu1 }
 0x3b9   : > { %v1778_v38 = vadd.f32 %v3602_v43, %v1777_v29  ;;  %2741 = vmatprep.mubr.f32.mxu0 %v1838_v59  ;;  %v1841_v54 = vmax.f32 %v1783_v53, 0.0 }
 0x3ba   : > { %v2669_v42 = vpop.f32.mrf.mxu1  ;;  %2742 = vmatmul.mubr.f32.gmra.mxu0 %v1839_v52 }
 0x3bb   : > { %v1840_v32 = vmax.f32 %v1778_v38, 0.0  ;;  %v1793_v55 = vadd.f32 %v2669_v42, %v3602_v43 }
 0x3bc   : > { %v1787_v60 = vpop.f32.mrf.mxu1 }
 0x3bd   : > { %v1788_v37 = vadd.f32 %v3602_v43, %v1787_v60  ;;  %2744 = vmatprep.mubr.f32.mxu0 %v1840_v32  ;;  %v1843_v61 = vmax.f32 %v1793_v55, 0.0 }
 0x3be   : > { %v2672_v40 = vpop.f32.mrf.mxu1  ;;  %2745 = vmatmul.mubr.f32.gmra.mxu0 %v1841_v54 }
 0x3bf   : > { %v1842_v57 = vmax.f32 %v1788_v37, 0.0  ;;  %v1803_v63 = vadd.f32 %v2672_v40, %v3602_v43 }
 0x3c0   : > { %v1797_v1 = vpop.f32.mrf.mxu1 }
 0x3c1   : > { %v1798_v5 = vadd.f32 %v3602_v43, %v1797_v1  ;;  %2747 = vmatprep.mubr.f32.mxu0 %v1842_v57  ;;  %v1845_v45 = vmax.f32 %v1803_v63, 0.0 }
 0x3c2   : > { %v2675_v4 = vpop.f32.mrf.mxu1  ;;  %2748 = vmatmul.mubr.f32.gmra.mxu0 %v1843_v61 }
 0x3c3   : > { %v1844_v8 = vmax.f32 %v1798_v5, 0.0  ;;  %v1813_v48 = vadd.f32 %v2675_v4, %v3602_v43 }
 0x3c4   : > { %v1807_v11 = vpop.f32.mrf.mxu1 }
 0x3c5   : > { %v1808_v62 = vadd.f32 %v3602_v43, %v1807_v11  ;;  %2750 = vmatprep.mubr.f32.mxu0 %v1844_v8  ;;  %v1847_v3 = vmax.f32 %v1813_v48, 0.0 }
 0x3c6   : > { %2751 = vmatmul.mubr.f32.gmra.mxu0 %v1845_v45 }
 0x3c7   : > { %v1846_v14 = vmax.f32 %v1808_v62, 0.0 }
 0x3c9   : > { %2753 = vmatprep.mubr.f32.mxu0 %v1846_v14 }
 0x3ca   : > { %2754 = vmatmul.mubr.f32.gmra.mxu0 %v1847_v3 }
 0x44e   : > { %v2710_v17 = vpop.f32.mrf.mxu0 }
 0x44f   : > { %v1943_v18 = vadd.f32 %v2710_v17, %v3639_v16 }
 0x450   : > { %v1937_v20 = vpop.f32.mrf.mxu0 }
 0x451   : > { %2097 = vst [vmem:[%s3142_s29 + $0x8] sm:$0xff] %v1943_v18  ;;  %v1938_v43 = vadd.f32 %v3639_v16, %v1937_v20 }
 0x452   : > { %v2713_v58 = vpop.f32.mrf.mxu0 }
 0x453   : > { %2096 = vst [vmem:[%s3142_s29] sm:$0xff] %v1938_v43  ;;  %v1953_v0 = vadd.f32 %v2713_v58, %v3639_v16 }
 0x454   : > { %v1947_v22 = vpop.f32.mrf.mxu0 }
 0x455   : > { %2099 = vst [vmem:[%s3142_s29 + $0x18] sm:$0xff] %v1953_v0  ;;  %v1948_v2 = vadd.f32 %v3639_v16, %v1947_v22 }
 0x456   : > { %v2716_v25 = vpop.f32.mrf.mxu0 }
 0x457   : > { %2098 = vst [vmem:[%s3142_s29 + $0x10] sm:$0xff] %v1948_v2  ;;  %v1963_v7 = vadd.f32 %v2716_v25, %v3639_v16 }
 0x458   : > { %v1957_v26 = vpop.f32.mrf.mxu0 }
 0x459   : > { %2101 = vst [vmem:[%s3142_s29 + $0x28] sm:$0xff] %v1963_v7  ;;  %v1958_v27 = vadd.f32 %v3639_v16, %v1957_v26 }
 0x45a   : > { %v2719_v28 = vpop.f32.mrf.mxu0 }
 0x45b   : > { %2100 = vst [vmem:[%s3142_s29 + $0x20] sm:$0xff] %v1958_v27  ;;  %v1973_v31 = vadd.f32 %v2719_v28, %v3639_v16 }
 0x45c   : > { %v1967_v9 = vpop.f32.mrf.mxu0 }
 0x45d   : > { %2103 = vst [vmem:[%s3142_s29 + $0x38] sm:$0xff] %v1973_v31  ;;  %v1968_v12 = vadd.f32 %v3639_v16, %v1967_v9 }
 0x45e   : > { %v2722_v6 = vpop.f32.mrf.mxu0 }
 0x45f   : > { %2102 = vst [vmem:[%s3142_s29 + $0x30] sm:$0xff] %v1968_v12  ;;  %v1983_v34 = vadd.f32 %v2722_v6, %v3639_v16 }
 0x460   : > { %v1977_v35 = vpop.f32.mrf.mxu0 }
 0x461   : > { %2105 = vst [vmem:[%s3142_s29 + $0x48] sm:$0xff] %v1983_v34  ;;  %v1978_v15 = vadd.f32 %v3639_v16, %v1977_v35 }
 0x462   : > { %v2725_v50 = vpop.f32.mrf.mxu0 }
 0x463   : > { %2104 = vst [vmem:[%s3142_s29 + $0x40] sm:$0xff] %v1978_v15  ;;  %v1993_v49 = vadd.f32 %v2725_v50, %v3639_v16 }
 0x464   : > { %v1987_v36 = vpop.f32.mrf.mxu0 }
 0x465   : > { %2107 = vst [vmem:[%s3142_s29 + $0x58] sm:$0xff] %v1993_v49  ;;  %v1988_v56 = vadd.f32 %v3639_v16, %v1987_v36 }
 0x466   : > { %v2728_v19 = vpop.f32.mrf.mxu0 }
 0x467   : > { %2106 = vst [vmem:[%s3142_s29 + $0x50] sm:$0xff] %v1988_v56  ;;  %v2003_v23 = vadd.f32 %v2728_v19, %v3639_v16 }
 0x468   : > { %v1997_v13 = vpop.f32.mrf.mxu0 }
 0x469   : > { %2109 = vst [vmem:[%s3142_s29 + $0x68] sm:$0xff] %v2003_v23  ;;  %v1998_v39 = vadd.f32 %v3639_v16, %v1997_v13 }
 0x46a   : > { %v2731_v41 = vpop.f32.mrf.mxu0 }
 0x46b   : > { %2108 = vst [vmem:[%s3142_s29 + $0x60] sm:$0xff] %v1998_v39  ;;  %v2013_v10 = vadd.f32 %v2731_v41, %v3639_v16 }
 0x46c   : > { %v2007_v44 = vpop.f32.mrf.mxu0 }
 0x46d   : > { %2111 = vst [vmem:[%s3142_s29 + $0x78] sm:$0xff] %v2013_v10  ;;  %v2008_v24 = vadd.f32 %v3639_v16, %v2007_v44 }
 0x46e   : > { %v2734_v46 = vpop.f32.mrf.mxu0 }
 0x46f   : > { %2110 = vst [vmem:[%s3142_s29 + $0x70] sm:$0xff] %v2008_v24  ;;  %v2023_v51 = vadd.f32 %v2734_v46, %v3639_v16 }
 0x470   : > { %v2017_v30 = vpop.f32.mrf.mxu0 }
 0x471   : > { %2113 = vst [vmem:[%s3142_s29 + $0x88] sm:$0xff] %v2023_v51  ;;  %v2018_v47 = vadd.f32 %v3639_v16, %v2017_v30 }
 0x472   : > { %v2737_v33 = vpop.f32.mrf.mxu0 }
 0x473   : > { %2112 = vst [vmem:[%s3142_s29 + $0x80] sm:$0xff] %v2018_v47  ;;  %v2033_v21 = vadd.f32 %v2737_v33, %v3639_v16 }
 0x474   : > { %v2027_v59 = vpop.f32.mrf.mxu0 }
 0x475   : > { %2115 = vst [vmem:[%s3142_s29 + $0x98] sm:$0xff] %v2033_v21  ;;  %v2028_v52 = vadd.f32 %v3639_v16, %v2027_v59 }
 0x476   : > { %v2740_v53 = vpop.f32.mrf.mxu0 }
 0x477   : > { %2114 = vst [vmem:[%s3142_s29 + $0x90] sm:$0xff] %v2028_v52  ;;  %v2043_v29 = vadd.f32 %v2740_v53, %v3639_v16 }
 0x478   : > { %v2037_v38 = vpop.f32.mrf.mxu0 }
 0x479   : > { %2117 = vst [vmem:[%s3142_s29 + $0xa8] sm:$0xff] %v2043_v29  ;;  %v2038_v42 = vadd.f32 %v3639_v16, %v2037_v38 }
 0x47a   : > { %v2743_v32 = vpop.f32.mrf.mxu0 }
 0x47b   : > { %2116 = vst [vmem:[%s3142_s29 + $0xa0] sm:$0xff] %v2038_v42  ;;  %v2053_v54 = vadd.f32 %v2743_v32, %v3639_v16 }
 0x47c   : > { %v2047_v55 = vpop.f32.mrf.mxu0 }
 0x47d   : > { %2119 = vst [vmem:[%s3142_s29 + $0xb8] sm:$0xff] %v2053_v54  ;;  %v2048_v60 = vadd.f32 %v3639_v16, %v2047_v55 }
 0x47e   : > { %v2746_v37 = vpop.f32.mrf.mxu0 }
 0x47f   : > { %2118 = vst [vmem:[%s3142_s29 + $0xb0] sm:$0xff] %v2048_v60  ;;  %v2063_v40 = vadd.f32 %v2746_v37, %v3639_v16 }
 0x480   : > { %v2057_v57 = vpop.f32.mrf.mxu0 }
 0x481   : > { %2121 = vst [vmem:[%s3142_s29 + $0xc8] sm:$0xff] %v2063_v40  ;;  %v2058_v61 = vadd.f32 %v3639_v16, %v2057_v57 }
 0x482   : > { %v2749_v63 = vpop.f32.mrf.mxu0 }
 0x483   : > { %2120 = vst [vmem:[%s3142_s29 + $0xc0] sm:$0xff] %v2058_v61  ;;  %v2073_v1 = vadd.f32 %v2749_v63, %v3639_v16 }
 0x484   : > { %v2067_v5 = vpop.f32.mrf.mxu0 }
 0x485   : > { %2123 = vst [vmem:[%s3142_s29 + $0xd8] sm:$0xff] %v2073_v1  ;;  %v2068_v4 = vadd.f32 %v3639_v16, %v2067_v5 }
 0x486   : > { %v2752_v8 = vpop.f32.mrf.mxu0 }
 0x487   : > { %2122 = vst [vmem:[%s3142_s29 + $0xd0] sm:$0xff] %v2068_v4  ;;  %v2083_v45 = vadd.f32 %v2752_v8, %v3639_v16 }
 0x488   : > { %v2077_v48 = vpop.f32.mrf.mxu0 }
 0x489   : > { %2125 = vst [vmem:[%s3142_s29 + $0xe8] sm:$0xff] %v2083_v45  ;;  %v2078_v11 = vadd.f32 %v3639_v16, %v2077_v48 }
 0x48a   : > { %v2755_v62 = vpop.f32.mrf.mxu0 }
 0x48b   : > { %2124 = vst [vmem:[%s3142_s29 + $0xe0] sm:$0xff] %v2078_v11  ;;  %v2093_v14 = vadd.f32 %v2755_v62, %v3639_v16 }
 0x48c   : > { %v2087_v3 = vpop.f32.mrf.mxu0 }
 0x48d   : > { %2127 = vst [vmem:[%s3142_s29 + $0xf8] sm:$0xff] %v2093_v14  ;;  %v2088_v17 = vadd.f32 %v3639_v16, %v2087_v3 }
 0x48f   : > { %2126 = vst [vmem:[%s3142_s29 + $0xf0] sm:$0xff] %v2088_v17 }
 0x490 PF: > { %s19_s15 = sadd.s32 1, %s2998_s15   ;;  %s3738_s26 = sld [smem:[#allocation4_spill]] }
 0x491   : > { %p16_p13 = scmp.ge.s32.totalorder %s19_s15, 6   ;;  %s3739_s30 = smov %s2978_s10 }
 0x492   : > { %s3740_s10 = smov %s3103_s22  ;;  %s3741_s11 = smov %s2990_s13 }
 0x493   : > { %s3742_s12 = smov %s2994_s14  ;;  %s3743_s13 = smov %s3746_s16 }
 0x494   :  { %18 = sbr.rel (!%p16_p13) target bundleno = 4 (0x4), region = 126 }
 0x496   : > { %s3744_s14 = smov %s3738_s26 }

</bundles_post_ra>
